<compile_context>
chip_gen: v7x
topology: tpu7x:2x2x1
jax: 0.10.0
libtpu: 0.0.40
codegen_flags: <defaults>
</compile_context>

<pallas_src>
import jax
import jax.numpy as jnp
import numpy as np
from jax import lax
from jax.experimental import pallas as pl
from jax.experimental.pallas import tpu as pltpu

NUM_GROUPS = 4
EPS = 1e-6
MXU_DTYPE = jnp.bfloat16   # conv / projection matmul operand dtype (accumulation stays f32)


# ----------------------------------- the Pallas kernel -----------------------------------

def _make_kernel(B, H, W, Cin, Cout, num_groups, use_projection, mxu_dtype):
    """Build the kernel closure for static shapes / shortcut flavour."""
    BH = B * H
    n_in = float(H * W * (Cin // num_groups))
    n_out = float(H * W * (Cout // num_groups))
    f32 = jnp.float32

    def kernel(*refs):
        if use_projection:
            (x_ref, pm_ref, pmt_ref, gin_ref, gint_ref, gout_ref, goutt_ref,
             g1_ref, be1_ref, band1_ref, b1_ref,
             g2_ref, be2_ref, band2_ref, b2_ref,
             wsb_ref, bsc_ref, o_ref) = refs
        else:
            (x_ref, pm_ref, pmt_ref, gin_ref, gint_ref, gout_ref, goutt_ref,
             g1_ref, be1_ref, band1_ref, b1_ref,
             g2_ref, be2_ref, band2_ref, b2_ref, o_ref) = refs

        pm = pm_ref[...]      # (B, B*H)  one-hot image selector (rows -> image)
        pmt = pmt_ref[...]    # (B*H, B)  its transpose (per-image broadcast back to rows)

        def group_norm(v, gsel_ref, gselt_ref, gamma_ref, beta_ref, n):
            # Per-image column sums and per-group sums via one-hot matmuls (MXU), then a
            # one-pass variance E[x^2] - mean^2 (clamped >= 0; fine for unit-scale data).
            colsum = jnp.dot(pm, v, preferred_element_type=f32)           # (B, W*C)
            colsq = jnp.dot(pm, v * v, preferred_element_type=f32)        # (B, W*C)
            gsel = gsel_ref[...]                                          # (W*C, G)
            gsum = jnp.dot(colsum, gsel, preferred_element_type=f32)      # (B, G)
            gsq = jnp.dot(colsq, gsel, preferred_element_type=f32)        # (B, G)
            mean_g = gsum * (1.0 / n)
            var_g = jnp.maximum(gsq * (1.0 / n) - mean_g * mean_g, 0.0)
            inv_g = lax.rsqrt(var_g + EPS)
            gselt = gselt_ref[...]                                        # (G, W*C)
            mean_r = jnp.dot(pmt, jnp.dot(mean_g, gselt, preferred_element_type=f32),
                             preferred_element_type=f32)                  # (B*H, W*C)
            inv_r = jnp.dot(pmt, jnp.dot(inv_g, gselt, preferred_element_type=f32),
                            preferred_element_type=f32)                   # (B*H, W*C)
            return (v - mean_r) * inv_r * gamma_ref[...] + beta_ref[...]

        def silu(v):
            return v * jax.nn.sigmoid(v)

        def conv3x3(v, band_ref, bias_ref):
            # v: (B*H, W*Ci).  The horizontal taps / padding are folded into the banded
            # weights; the vertical taps come from in-register sublane rolls with the rows
            # that would wrap across an image boundary zeroed (== zero padding along H).
            row = lax.broadcasted_iota(jnp.int32, v.shape, 0) % H
            up = jnp.where(row == 0, 0.0, pltpu.roll(v, shift=1, axis=0))         # row h-1
            dn = jnp.where(row == H - 1, 0.0, pltpu.roll(v, shift=BH - 1, axis=0))  # row h+1
            acc = jnp.dot(up.astype(mxu_dtype), band_ref[0], preferred_element_type=f32)
            acc = acc + jnp.dot(v.astype(mxu_dtype), band_ref[1], preferred_element_type=f32)
            acc = acc + jnp.dot(dn.astype(mxu_dtype), band_ref[2], preferred_element_type=f32)
            return acc + bias_ref[...]

        x = x_ref[...]                                   # (B*H, W*Cin) f32 slab

        t = group_norm(x, gin_ref, gint_ref, g1_ref, be1_ref, n_in)
        t = silu(t)
        t = conv3x3(t, band1_ref, b1_ref)                # (B*H, W*Cout)
        t = group_norm(t, gout_ref, goutt_ref, g2_ref, be2_ref, n_out)
        t = silu(t)
        t = conv3x3(t, band2_ref, b2_ref)

        if use_projection:
            sc = jnp.dot(x.astype(mxu_dtype), wsb_ref[...],
                         preferred_element_type=f32) + bsc_ref[...]
        else:
            sc = x                                       # nn.Identity shortcut

        # lane-dense (B*H, W*Cout) store: last dim is a multiple of 128 -> unmasked vst
        o_ref[...] = (sc + t).astype(o_ref.dtype)

    return kernel


# ----------------------------- one-time host-side preparation ----------------------------

def prepare_params(p, B, H, W, num_groups=NUM_GROUPS, mxu_dtype=MXU_DTYPE):
    """Build banded conv weights, per-column affine rows and one-hot selector matrices ONCE
    (they depend only on params and geometry), so they are not rebuilt / re-streamed per call."""
    f32 = jnp.float32
    Cin, Cout = p["w1"].shape[2], p["w1"].shape[3]
    assert Cin % num_groups == 0 and Cout % num_groups == 0

    def cols(v, C):
        # per-channel vector -> per-column row (1, W*C); column j = w*C + c
        return jnp.tile(v.reshape(C).astype(f32), W).reshape(1, W * C)

    def band3x3(w):
        # HWIO (3,3,Ci,Co) -> (3, W*Ci, W*Co) block-banded matrices; horizontal zero padding
        # is folded in (out-of-range dx taps are simply absent).
        Ci, Co = w.shape[2], w.shape[3]
        bands = []
        for dy in range(3):
            m = jnp.zeros((W * Ci, W * Co), f32)
            for dx in range(3):
                m = m + jnp.kron(jnp.eye(W, W, k=1 - dx, dtype=f32),
                                 w[dy, dx].astype(f32))
            bands.append(m)
        return jnp.stack(bands, 0).astype(mxu_dtype)

    def group_onehot(C):
        gid = (np.arange(W * C) % C) // (C // num_groups)
        G = (gid[:, None] == np.arange(num_groups)[None, :]).astype(np.float32)
        return jnp.asarray(G), jnp.asarray(np.ascontiguousarray(G.T))

    img = np.arange(B * H) // H
    Pm = (np.arange(B)[:, None] == img[None, :]).astype(np.float32)

    g_in, gt_in = group_onehot(Cin)
    g_out, gt_out = group_onehot(Cout)

    prep = {
        "pm": jnp.asarray(Pm),
        "pmt": jnp.asarray(np.ascontiguousarray(Pm.T)),
        "g_in": g_in, "gt_in": gt_in, "g_out": g_out, "gt_out": gt_out,
        "g1": cols(p["g1"], Cin), "be1": cols(p["be1"], Cin),
        "band1": band3x3(p["w1"]), "b1": cols(p["b1"], Cout),
        "g2": cols(p["g2"], Cout), "be2": cols(p["be2"], Cout),
        "band2": band3x3(p["w2"]), "b2": cols(p["b2"], Cout),
    }
    if "ws" in p:   # 1x1-conv projection shortcut
        prep["ws_band"] = jnp.kron(jnp.eye(W, dtype=f32),
                                   p["ws"].astype(f32)).astype(mxu_dtype)
        prep["bs"] = cols(p["bs"], Cout)
    return prep


# --------------------------------------- wrapper ----------------------------------------

def residual_block(x, prep, num_groups=NUM_GROUPS):
    """x: (B, H, W, Cin) float32 NHWC.  Returns (B, H, W, Cout)."""
    B, H, W, Cin = x.shape
    Cout = prep["b1"].shape[1] // W
    use_projection = "ws_band" in prep
    assert use_projection == (Cin != Cout)
    mxu_dtype = prep["band1"].dtype

    x2d = x.reshape(B * H, W * Cin)                  # lane-dense slab (pure view reshape)

    args = [x2d, prep["pm"], prep["pmt"],
            prep["g_in"], prep["gt_in"], prep["g_out"], prep["gt_out"],
            prep["g1"], prep["be1"], prep["band1"], prep["b1"],
            prep["g2"], prep["be2"], prep["band2"], prep["b2"]]
    if use_projection:
        args += [prep["ws_band"], prep["bs"]]

    def full_spec(shape):
        n = len(shape)
        return pl.BlockSpec(shape, lambda i, _n=n: (0,) * _n)

    grid_spec = pltpu.PrefetchScalarGridSpec(
        num_scalar_prefetch=0,
        grid=(1,),                                    # whole (tiny) problem in one grid step
        in_specs=[full_spec(a.shape) for a in args],
        out_specs=full_spec((B * H, W * Cout)),       # last dim = W*Cout (128): lane-dense
    )

    out2d = pl.pallas_call(
        _make_kernel(B, H, W, Cin, Cout, num_groups, use_projection, mxu_dtype),
        out_shape=jax.ShapeDtypeStruct((B * H, W * Cout), jnp.float32),
        grid_spec=grid_spec,
        compiler_params=pltpu.CompilerParams(
            dimension_semantics=("arbitrary",),
            vmem_limit_bytes=32 * 1024 * 1024,        # explicit budget (<= default on all gens)
        ),
    )(*args)

    return out2d.reshape(B, H, W, Cout)


# -------------------------- deterministic parameter construction -------------------------

def init_params(key, cin, cout):
    ks = jax.random.split(key, 11)
    p = {
        "g1":  1.0 + 0.1 * jax.random.normal(ks[0], (1, 1, cin), jnp.float32),
        "be1": 0.1 * jax.random.normal(ks[1], (1, 1, cin), jnp.float32),
        "w1":  0.1 * jax.random.normal(ks[2], (3, 3, cin, cout), jnp.float32),  # HWIO
        "b1":  0.1 * jax.random.normal(ks[3], (1, 1, cout), jnp.float32),
        "g2":  1.0 + 0.1 * jax.random.normal(ks[4], (1, 1, cout), jnp.float32),
        "be2": 0.1 * jax.random.normal(ks[5], (1, 1, cout), jnp.float32),
        "w2":  0.1 * jax.random.normal(ks[6], (3, 3, cout, cout), jnp.float32),
        "b2":  0.1 * jax.random.normal(ks[7], (1, 1, cout), jnp.float32),
    }
    if cin != cout:                                  # 1x1-conv projection shortcut
        p["ws"] = 0.1 * jax.random.normal(ks[8], (cin, cout), jnp.float32)
        p["bs"] = 0.1 * jax.random.normal(ks[9], (1, 1, cout), jnp.float32)
    # cin == cout: nn.Identity() shortcut -> no parameters, kernel just adds x
    return p


# ----------------------------------- pure-JAX reference ----------------------------------

def reference(x, p):
    def gn(v, gamma, beta):
        B, H, W, C = v.shape
        vg = v.reshape(B, H, W, NUM_GROUPS, C // NUM_GROUPS)
        mean = vg.mean(axis=(1, 2, 4), keepdims=True)
        var = vg.var(axis=(1, 2, 4), keepdims=True)
        vn = ((vg - mean) / jnp.sqrt(var + EPS)).reshape(B, H, W, C)
        return vn * gamma + beta

    def conv(v, w, b):
        return lax.conv_general_dilated(
            v, w, window_strides=(1, 1), padding="SAME",
            dimension_numbers=("NHWC", "HWIO", "NHWC")) + b

    t = gn(x, p["g1"], p["be1"])
    t = t * jax.nn.sigmoid(t)
    t = conv(t, p["w1"], p["b1"])
    t = gn(t, p["g2"], p["be2"])
    t = t * jax.nn.sigmoid(t)
    t = conv(t, p["w2"], p["b2"])
    if "ws" in p:
        sc = conv(x, p["ws"][None, None], p["bs"])
    else:
        sc = x
    return sc + t


# ------------------------------------------ main -----------------------------------------

if __name__ == "__main__":
    # PyTorch NCHW equivalent input: [2, 4, 16, 16] -> NHWC (2, 16, 16, 4), Cout = 8
    B, H, W, Cin, Cout = 2, 16, 16, 4, 8
    key = jax.random.PRNGKey(0)
    kx, kp = jax.random.split(key)
    x = jax.random.normal(kx, (B, H, W, Cin), jnp.float32)
    params = init_params(kp, Cin, Cout)

    prep = prepare_params(params, B, H, W)        # one-time weight prep (cached across calls)
    out = residual_block(x, prep)
    jax.block_until_ready(out)

    ref = reference(x, params)
    # bf16 MXU operands (f32 accumulate) bound the error to ~1e-3 of unit-scale outputs;
    # with MXU_DTYPE = jnp.float32 the kernel matches the f32 reference at 2e-4.
    tol = 2e-2 if MXU_DTYPE == jnp.bfloat16 else 2e-4
    np.testing.assert_allclose(np.asarray(out), np.asarray(ref), rtol=tol, atol=tol)

    print("KERNEL_OK")
</pallas_src>

<mosaic_0001>
module attributes {stable_mosaic.version = 11 : i64} {
  func.func @kernel(%arg0: i32, %arg1: memref<32x64xf32, #tpu.memory_space<vmem>>, %arg2: memref<2x32xf32, #tpu.memory_space<vmem>>, %arg3: memref<32x2xf32, #tpu.memory_space<vmem>>, %arg4: memref<64x4xf32, #tpu.memory_space<vmem>>, %arg5: memref<4x64xf32, #tpu.memory_space<vmem>>, %arg6: memref<128x4xf32, #tpu.memory_space<vmem>>, %arg7: memref<4x128xf32, #tpu.memory_space<vmem>>, %arg8: memref<1x64xf32, #tpu.memory_space<vmem>>, %arg9: memref<1x64xf32, #tpu.memory_space<vmem>>, %arg10: memref<3x64x128xbf16, #tpu.memory_space<vmem>>, %arg11: memref<1x128xf32, #tpu.memory_space<vmem>>, %arg12: memref<1x128xf32, #tpu.memory_space<vmem>>, %arg13: memref<1x128xf32, #tpu.memory_space<vmem>>, %arg14: memref<3x128x128xbf16, #tpu.memory_space<vmem>>, %arg15: memref<1x128xf32, #tpu.memory_space<vmem>>, %arg16: memref<64x128xbf16, #tpu.memory_space<vmem>>, %arg17: memref<1x128xf32, #tpu.memory_space<vmem>>, %arg18: memref<32x128xf32, #tpu.memory_space<vmem>>) attributes {dimension_semantics = [#tpu.dimension_semantics<arbitrary>], iteration_bounds = array<i64: 1>, scalar_prefetch = 0 : i64, scratch_operands = 0 : i64, tpu.core_type = #tpu.core_type<tc>, window_params = [{pipeline_mode = #tpu.pipeline_mode<synchronous>, transform_indices = @transform_0, window_bounds = array<i64: 32, 64>}, {pipeline_mode = #tpu.pipeline_mode<synchronous>, transform_indices = @transform_1, window_bounds = array<i64: 2, 32>}, {pipeline_mode = #tpu.pipeline_mode<synchronous>, transform_indices = @transform_2, window_bounds = array<i64: 32, 2>}, {pipeline_mode = #tpu.pipeline_mode<synchronous>, transform_indices = @transform_3, window_bounds = array<i64: 64, 4>}, {pipeline_mode = #tpu.pipeline_mode<synchronous>, transform_indices = @transform_4, window_bounds = array<i64: 4, 64>}, {pipeline_mode = #tpu.pipeline_mode<synchronous>, transform_indices = @transform_5, window_bounds = array<i64: 128, 4>}, {pipeline_mode = #tpu.pipeline_mode<synchronous>, transform_indices = @transform_6, window_bounds = array<i64: 4, 128>}, {pipeline_mode = #tpu.pipeline_mode<synchronous>, transform_indices = @transform_7, window_bounds = array<i64: 1, 64>}, {pipeline_mode = #tpu.pipeline_mode<synchronous>, transform_indices = @transform_8, window_bounds = array<i64: 1, 64>}, {pipeline_mode = #tpu.pipeline_mode<synchronous>, transform_indices = @transform_9, window_bounds = array<i64: 3, 64, 128>}, {pipeline_mode = #tpu.pipeline_mode<synchronous>, transform_indices = @transform_10, window_bounds = array<i64: 1, 128>}, {pipeline_mode = #tpu.pipeline_mode<synchronous>, transform_indices = @transform_11, window_bounds = array<i64: 1, 128>}, {pipeline_mode = #tpu.pipeline_mode<synchronous>, transform_indices = @transform_12, window_bounds = array<i64: 1, 128>}, {pipeline_mode = #tpu.pipeline_mode<synchronous>, transform_indices = @transform_13, window_bounds = array<i64: 3, 128, 128>}, {pipeline_mode = #tpu.pipeline_mode<synchronous>, transform_indices = @transform_14, window_bounds = array<i64: 1, 128>}, {pipeline_mode = #tpu.pipeline_mode<synchronous>, transform_indices = @transform_15, window_bounds = array<i64: 64, 128>}, {pipeline_mode = #tpu.pipeline_mode<synchronous>, transform_indices = @transform_16, window_bounds = array<i64: 1, 128>}, {pipeline_mode = #tpu.pipeline_mode<synchronous>, transform_indices = @transform_17, window_bounds = array<i64: 32, 128>}]} {
    %c0 = arith.constant 0 : index
    %c0_0 = arith.constant 0 : index
    %0 = vector.load %arg2[%c0, %c0_0] : memref<2x32xf32, #tpu.memory_space<vmem>>, vector<2x32xf32>
    %c0_1 = arith.constant 0 : index
    %c0_2 = arith.constant 0 : index
    %1 = vector.load %arg3[%c0_1, %c0_2] : memref<32x2xf32, #tpu.memory_space<vmem>>, vector<32x2xf32>
    %c0_3 = arith.constant 0 : index
    %c0_4 = arith.constant 0 : index
    %2 = vector.load %arg1[%c0_3, %c0_4] : memref<32x64xf32, #tpu.memory_space<vmem>>, vector<32x64xf32>
    %cst = arith.constant dense<0.000000e+00> : vector<2x64xf32>
    %3 = tpu.matmul %0, %2, %cst {dimension_numbers = #tpu.dot_dimension_numbers<[1], [0], [0], [1], [0, 0, 1, 1], [], []>} : vector<2x32xf32>, vector<32x64xf32>, vector<2x64xf32> -> vector<2x64xf32>
    %4 = arith.mulf %2, %2 : vector<32x64xf32>
    %cst_5 = arith.constant dense<0.000000e+00> : vector<2x64xf32>
    %5 = tpu.matmul %0, %4, %cst_5 {dimension_numbers = #tpu.dot_dimension_numbers<[1], [0], [0], [1], [0, 0, 1, 1], [], []>} : vector<2x32xf32>, vector<32x64xf32>, vector<2x64xf32> -> vector<2x64xf32>
    %c0_6 = arith.constant 0 : index
    %c0_7 = arith.constant 0 : index
    %6 = vector.load %arg4[%c0_6, %c0_7] : memref<64x4xf32, #tpu.memory_space<vmem>>, vector<64x4xf32>
    %cst_8 = arith.constant dense<0.000000e+00> : vector<2x4xf32>
    %7 = tpu.matmul %3, %6, %cst_8 {dimension_numbers = #tpu.dot_dimension_numbers<[1], [0], [0], [1], [0, 0, 1, 1], [], []>} : vector<2x64xf32>, vector<64x4xf32>, vector<2x4xf32> -> vector<2x4xf32>
    %cst_9 = arith.constant dense<0.000000e+00> : vector<2x4xf32>
    %8 = tpu.matmul %5, %6, %cst_9 {dimension_numbers = #tpu.dot_dimension_numbers<[1], [0], [0], [1], [0, 0, 1, 1], [], []>} : vector<2x64xf32>, vector<64x4xf32>, vector<2x4xf32> -> vector<2x4xf32>
    %cst_10 = arith.constant 3.906250e-03 : f32
    %9 = vector.broadcast %cst_10 : f32 to vector<2x4xf32>
    %10 = arith.mulf %7, %9 : vector<2x4xf32>
    %cst_11 = arith.constant 3.906250e-03 : f32
    %11 = vector.broadcast %cst_11 : f32 to vector<2x4xf32>
    %12 = arith.mulf %8, %11 : vector<2x4xf32>
    %13 = arith.mulf %10, %10 : vector<2x4xf32>
    %14 = arith.subf %12, %13 : vector<2x4xf32>
    %cst_12 = arith.constant 0.000000e+00 : f32
    %15 = vector.broadcast %cst_12 : f32 to vector<2x4xf32>
    %16 = arith.maximumf %14, %15 : vector<2x4xf32>
    %cst_13 = arith.constant 9.99999997E-7 : f32
    %17 = vector.broadcast %cst_13 : f32 to vector<2x4xf32>
    %18 = arith.addf %16, %17 : vector<2x4xf32>
    %19 = math.rsqrt %18 : vector<2x4xf32>
    %c0_14 = arith.constant 0 : index
    %c0_15 = arith.constant 0 : index
    %20 = vector.load %arg5[%c0_14, %c0_15] : memref<4x64xf32, #tpu.memory_space<vmem>>, vector<4x64xf32>
    %cst_16 = arith.constant dense<0.000000e+00> : vector<2x64xf32>
    %21 = tpu.matmul %10, %20, %cst_16 {dimension_numbers = #tpu.dot_dimension_numbers<[1], [0], [0], [1], [0, 0, 1, 1], [], []>} : vector<2x4xf32>, vector<4x64xf32>, vector<2x64xf32> -> vector<2x64xf32>
    %cst_17 = arith.constant dense<0.000000e+00> : vector<32x64xf32>
    %22 = tpu.matmul %1, %21, %cst_17 {dimension_numbers = #tpu.dot_dimension_numbers<[1], [0], [0], [1], [0, 0, 1, 1], [], []>} : vector<32x2xf32>, vector<2x64xf32>, vector<32x64xf32> -> vector<32x64xf32>
    %cst_18 = arith.constant dense<0.000000e+00> : vector<2x64xf32>
    %23 = tpu.matmul %19, %20, %cst_18 {dimension_numbers = #tpu.dot_dimension_numbers<[1], [0], [0], [1], [0, 0, 1, 1], [], []>} : vector<2x4xf32>, vector<4x64xf32>, vector<2x64xf32> -> vector<2x64xf32>
    %cst_19 = arith.constant dense<0.000000e+00> : vector<32x64xf32>
    %24 = tpu.matmul %1, %23, %cst_19 {dimension_numbers = #tpu.dot_dimension_numbers<[1], [0], [0], [1], [0, 0, 1, 1], [], []>} : vector<32x2xf32>, vector<2x64xf32>, vector<32x64xf32> -> vector<32x64xf32>
    %25 = arith.subf %2, %22 : vector<32x64xf32>
    %26 = arith.mulf %25, %24 : vector<32x64xf32>
    %c0_20 = arith.constant 0 : index
    %c0_21 = arith.constant 0 : index
    %27 = vector.load %arg8[%c0_20, %c0_21] : memref<1x64xf32, #tpu.memory_space<vmem>>, vector<1x64xf32>
    %28 = vector.broadcast %27 : vector<1x64xf32> to vector<32x64xf32>
    %29 = arith.mulf %26, %28 : vector<32x64xf32>
    %c0_22 = arith.constant 0 : index
    %c0_23 = arith.constant 0 : index
    %30 = vector.load %arg9[%c0_22, %c0_23] : memref<1x64xf32, #tpu.memory_space<vmem>>, vector<1x64xf32>
    %31 = vector.broadcast %30 : vector<1x64xf32> to vector<32x64xf32>
    %32 = arith.addf %29, %31 : vector<32x64xf32>
    %33 = arith.negf %32 : vector<32x64xf32>
    %34 = math.exp %33 : vector<32x64xf32>
    %cst_24 = arith.constant 1.000000e+00 : f32
    %35 = vector.broadcast %cst_24 : f32 to vector<32x64xf32>
    %36 = arith.addf %35, %34 : vector<32x64xf32>
    %37 = arith.divf %35, %36 : vector<32x64xf32>
    %38 = arith.mulf %32, %37 : vector<32x64xf32>
    %39 = tpu.iota {dimensions = array<i32: 0>} : vector<32x64xi32>
    %c16_i32 = arith.constant 16 : i32
    %c0_i32 = arith.constant 0 : i32
    %40 = arith.cmpi eq, %c16_i32, %c0_i32 : i32
    %c1_i32 = arith.constant 1 : i32
    %41 = arith.select %40, %c1_i32, %c16_i32 : i32
    %42 = vector.broadcast %41 : i32 to vector<32x64xi32>
    %43 = arith.remsi %39, %42 : vector<32x64xi32>
    %c0_i32_25 = arith.constant 0 : i32
    %44 = vector.broadcast %c0_i32_25 : i32 to vector<32x64xi32>
    %45 = arith.cmpi ne, %43, %44 : vector<32x64xi32>
    %c0_i32_26 = arith.constant 0 : i32
    %46 = vector.broadcast %c0_i32_26 : i32 to vector<32x64xi32>
    %47 = arith.cmpi slt, %43, %46 : vector<32x64xi32>
    %c0_i32_27 = arith.constant 0 : i32
    %48 = arith.cmpi slt, %41, %c0_i32_27 : i32
    %49 = vector.broadcast %48 : i1 to vector<32x64xi1>
    %50 = vector.broadcast %49 : vector<32x64xi1> to vector<32x64xi1>
    %51 = arith.xori %47, %50 : vector<32x64xi1>
    %52 = arith.andi %51, %45 : vector<32x64xi1>
    %53 = vector.broadcast %41 : i32 to vector<32x64xi32>
    %54 = arith.addi %43, %53 : vector<32x64xi32>
    %55 = arith.select %52, %54, %43 : vector<32x64xi1>, vector<32x64xi32>
    %c0_i32_28 = arith.constant 0 : i32
    %56 = vector.broadcast %c0_i32_28 : i32 to vector<32x64xi32>
    %57 = arith.cmpi eq, %55, %56 : vector<32x64xi32>
    %c1_i32_29 = arith.constant 1 : i32
    %58 = tpu.dynamic_rotate %38 by %c1_i32_29 dim 0 : vector<32x64xf32>, i32 -> vector<32x64xf32>
    %cst_30 = arith.constant 0.000000e+00 : f32
    %59 = vector.broadcast %cst_30 : f32 to vector<32x64xf32>
    %60 = arith.select %57, %59, %58 : vector<32x64xi1>, vector<32x64xf32>
    %c15_i32 = arith.constant 15 : i32
    %61 = vector.broadcast %c15_i32 : i32 to vector<32x64xi32>
    %62 = arith.cmpi eq, %55, %61 : vector<32x64xi32>
    %c31_i32 = arith.constant 31 : i32
    %63 = tpu.dynamic_rotate %38 by %c31_i32 dim 0 : vector<32x64xf32>, i32 -> vector<32x64xf32>
    %cst_31 = arith.constant 0.000000e+00 : f32
    %64 = vector.broadcast %cst_31 : f32 to vector<32x64xf32>
    %65 = arith.select %62, %64, %63 : vector<32x64xi1>, vector<32x64xf32>
    %66 = arith.truncf %60 : vector<32x64xf32> to vector<32x64xbf16>
    %c0_32 = arith.constant 0 : index
    %c0_33 = arith.constant 0 : index
    %c0_34 = arith.constant 0 : index
    %67 = vector.load %arg10[%c0_32, %c0_33, %c0_34] : memref<3x64x128xbf16, #tpu.memory_space<vmem>>, vector<1x64x128xbf16>
    %68 = vector.shape_cast %67 : vector<1x64x128xbf16> to vector<64x128xbf16>
    %cst_35 = arith.constant dense<0.000000e+00> : vector<32x128xf32>
    %69 = tpu.matmul %66, %68, %cst_35 {dimension_numbers = #tpu.dot_dimension_numbers<[1], [0], [0], [1], [0, 0, 1, 1], [], []>} : vector<32x64xbf16>, vector<64x128xbf16>, vector<32x128xf32> -> vector<32x128xf32>
    %70 = arith.truncf %38 : vector<32x64xf32> to vector<32x64xbf16>
    %c1 = arith.constant 1 : index
    %c0_36 = arith.constant 0 : index
    %c0_37 = arith.constant 0 : index
    %71 = vector.load %arg10[%c1, %c0_36, %c0_37] : memref<3x64x128xbf16, #tpu.memory_space<vmem>>, vector<1x64x128xbf16>
    %72 = vector.shape_cast %71 : vector<1x64x128xbf16> to vector<64x128xbf16>
    %cst_38 = arith.constant dense<0.000000e+00> : vector<32x128xf32>
    %73 = tpu.matmul %70, %72, %cst_38 {dimension_numbers = #tpu.dot_dimension_numbers<[1], [0], [0], [1], [0, 0, 1, 1], [], []>} : vector<32x64xbf16>, vector<64x128xbf16>, vector<32x128xf32> -> vector<32x128xf32>
    %74 = arith.addf %69, %73 : vector<32x128xf32>
    %75 = arith.truncf %65 : vector<32x64xf32> to vector<32x64xbf16>
    %c2 = arith.constant 2 : index
    %c0_39 = arith.constant 0 : index
    %c0_40 = arith.constant 0 : index
    %76 = vector.load %arg10[%c2, %c0_39, %c0_40] : memref<3x64x128xbf16, #tpu.memory_space<vmem>>, vector<1x64x128xbf16>
    %77 = vector.shape_cast %76 : vector<1x64x128xbf16> to vector<64x128xbf16>
    %cst_41 = arith.constant dense<0.000000e+00> : vector<32x128xf32>
    %78 = tpu.matmul %75, %77, %cst_41 {dimension_numbers = #tpu.dot_dimension_numbers<[1], [0], [0], [1], [0, 0, 1, 1], [], []>} : vector<32x64xbf16>, vector<64x128xbf16>, vector<32x128xf32> -> vector<32x128xf32>
    %79 = arith.addf %74, %78 : vector<32x128xf32>
    %c0_42 = arith.constant 0 : index
    %c0_43 = arith.constant 0 : index
    %80 = vector.load %arg11[%c0_42, %c0_43] : memref<1x128xf32, #tpu.memory_space<vmem>>, vector<1x128xf32>
    %81 = vector.broadcast %80 : vector<1x128xf32> to vector<32x128xf32>
    %82 = arith.addf %79, %81 : vector<32x128xf32>
    %cst_44 = arith.constant dense<0.000000e+00> : vector<2x128xf32>
    %83 = tpu.matmul %0, %82, %cst_44 {dimension_numbers = #tpu.dot_dimension_numbers<[1], [0], [0], [1], [0, 0, 1, 1], [], []>} : vector<2x32xf32>, vector<32x128xf32>, vector<2x128xf32> -> vector<2x128xf32>
    %84 = arith.mulf %82, %82 : vector<32x128xf32>
    %cst_45 = arith.constant dense<0.000000e+00> : vector<2x128xf32>
    %85 = tpu.matmul %0, %84, %cst_45 {dimension_numbers = #tpu.dot_dimension_numbers<[1], [0], [0], [1], [0, 0, 1, 1], [], []>} : vector<2x32xf32>, vector<32x128xf32>, vector<2x128xf32> -> vector<2x128xf32>
    %c0_46 = arith.constant 0 : index
    %c0_47 = arith.constant 0 : index
    %86 = vector.load %arg6[%c0_46, %c0_47] : memref<128x4xf32, #tpu.memory_space<vmem>>, vector<128x4xf32>
    %cst_48 = arith.constant dense<0.000000e+00> : vector<2x4xf32>
    %87 = tpu.matmul %83, %86, %cst_48 {dimension_numbers = #tpu.dot_dimension_numbers<[1], [0], [0], [1], [0, 0, 1, 1], [], []>} : vector<2x128xf32>, vector<128x4xf32>, vector<2x4xf32> -> vector<2x4xf32>
    %cst_49 = arith.constant dense<0.000000e+00> : vector<2x4xf32>
    %88 = tpu.matmul %85, %86, %cst_49 {dimension_numbers = #tpu.dot_dimension_numbers<[1], [0], [0], [1], [0, 0, 1, 1], [], []>} : vector<2x128xf32>, vector<128x4xf32>, vector<2x4xf32> -> vector<2x4xf32>
    %cst_50 = arith.constant 0.001953125 : f32
    %89 = vector.broadcast %cst_50 : f32 to vector<2x4xf32>
    %90 = arith.mulf %87, %89 : vector<2x4xf32>
    %cst_51 = arith.constant 0.001953125 : f32
    %91 = vector.broadcast %cst_51 : f32 to vector<2x4xf32>
    %92 = arith.mulf %88, %91 : vector<2x4xf32>
    %93 = arith.mulf %90, %90 : vector<2x4xf32>
    %94 = arith.subf %92, %93 : vector<2x4xf32>
    %cst_52 = arith.constant 0.000000e+00 : f32
    %95 = vector.broadcast %cst_52 : f32 to vector<2x4xf32>
    %96 = arith.maximumf %94, %95 : vector<2x4xf32>
    %cst_53 = arith.constant 9.99999997E-7 : f32
    %97 = vector.broadcast %cst_53 : f32 to vector<2x4xf32>
    %98 = arith.addf %96, %97 : vector<2x4xf32>
    %99 = math.rsqrt %98 : vector<2x4xf32>
    %c0_54 = arith.constant 0 : index
    %c0_55 = arith.constant 0 : index
    %100 = vector.load %arg7[%c0_54, %c0_55] : memref<4x128xf32, #tpu.memory_space<vmem>>, vector<4x128xf32>
    %cst_56 = arith.constant dense<0.000000e+00> : vector<2x128xf32>
    %101 = tpu.matmul %90, %100, %cst_56 {dimension_numbers = #tpu.dot_dimension_numbers<[1], [0], [0], [1], [0, 0, 1, 1], [], []>} : vector<2x4xf32>, vector<4x128xf32>, vector<2x128xf32> -> vector<2x128xf32>
    %cst_57 = arith.constant dense<0.000000e+00> : vector<32x128xf32>
    %102 = tpu.matmul %1, %101, %cst_57 {dimension_numbers = #tpu.dot_dimension_numbers<[1], [0], [0], [1], [0, 0, 1, 1], [], []>} : vector<32x2xf32>, vector<2x128xf32>, vector<32x128xf32> -> vector<32x128xf32>
    %cst_58 = arith.constant dense<0.000000e+00> : vector<2x128xf32>
    %103 = tpu.matmul %99, %100, %cst_58 {dimension_numbers = #tpu.dot_dimension_numbers<[1], [0], [0], [1], [0, 0, 1, 1], [], []>} : vector<2x4xf32>, vector<4x128xf32>, vector<2x128xf32> -> vector<2x128xf32>
    %cst_59 = arith.constant dense<0.000000e+00> : vector<32x128xf32>
    %104 = tpu.matmul %1, %103, %cst_59 {dimension_numbers = #tpu.dot_dimension_numbers<[1], [0], [0], [1], [0, 0, 1, 1], [], []>} : vector<32x2xf32>, vector<2x128xf32>, vector<32x128xf32> -> vector<32x128xf32>
    %105 = arith.subf %82, %102 : vector<32x128xf32>
    %106 = arith.mulf %105, %104 : vector<32x128xf32>
    %c0_60 = arith.constant 0 : index
    %c0_61 = arith.constant 0 : index
    %107 = vector.load %arg12[%c0_60, %c0_61] : memref<1x128xf32, #tpu.memory_space<vmem>>, vector<1x128xf32>
    %108 = vector.broadcast %107 : vector<1x128xf32> to vector<32x128xf32>
    %109 = arith.mulf %106, %108 : vector<32x128xf32>
    %c0_62 = arith.constant 0 : index
    %c0_63 = arith.constant 0 : index
    %110 = vector.load %arg13[%c0_62, %c0_63] : memref<1x128xf32, #tpu.memory_space<vmem>>, vector<1x128xf32>
    %111 = vector.broadcast %110 : vector<1x128xf32> to vector<32x128xf32>
    %112 = arith.addf %109, %111 : vector<32x128xf32>
    %113 = arith.negf %112 : vector<32x128xf32>
    %114 = math.exp %113 : vector<32x128xf32>
    %cst_64 = arith.constant 1.000000e+00 : f32
    %115 = vector.broadcast %cst_64 : f32 to vector<32x128xf32>
    %116 = arith.addf %115, %114 : vector<32x128xf32>
    %117 = arith.divf %115, %116 : vector<32x128xf32>
    %118 = arith.mulf %112, %117 : vector<32x128xf32>
    %119 = tpu.iota {dimensions = array<i32: 0>} : vector<32x128xi32>
    %c16_i32_65 = arith.constant 16 : i32
    %c0_i32_66 = arith.constant 0 : i32
    %120 = arith.cmpi eq, %c16_i32_65, %c0_i32_66 : i32
    %c1_i32_67 = arith.constant 1 : i32
    %121 = arith.select %120, %c1_i32_67, %c16_i32_65 : i32
    %122 = vector.broadcast %121 : i32 to vector<32x128xi32>
    %123 = arith.remsi %119, %122 : vector<32x128xi32>
    %c0_i32_68 = arith.constant 0 : i32
    %124 = vector.broadcast %c0_i32_68 : i32 to vector<32x128xi32>
    %125 = arith.cmpi ne, %123, %124 : vector<32x128xi32>
    %c0_i32_69 = arith.constant 0 : i32
    %126 = vector.broadcast %c0_i32_69 : i32 to vector<32x128xi32>
    %127 = arith.cmpi slt, %123, %126 : vector<32x128xi32>
    %c0_i32_70 = arith.constant 0 : i32
    %128 = arith.cmpi slt, %121, %c0_i32_70 : i32
    %129 = vector.broadcast %128 : i1 to vector<32x128xi1>
    %130 = vector.broadcast %129 : vector<32x128xi1> to vector<32x128xi1>
    %131 = arith.xori %127, %130 : vector<32x128xi1>
    %132 = arith.andi %131, %125 : vector<32x128xi1>
    %133 = vector.broadcast %121 : i32 to vector<32x128xi32>
    %134 = arith.addi %123, %133 : vector<32x128xi32>
    %135 = arith.select %132, %134, %123 : vector<32x128xi1>, vector<32x128xi32>
    %c0_i32_71 = arith.constant 0 : i32
    %136 = vector.broadcast %c0_i32_71 : i32 to vector<32x128xi32>
    %137 = arith.cmpi eq, %135, %136 : vector<32x128xi32>
    %c1_i32_72 = arith.constant 1 : i32
    %138 = tpu.dynamic_rotate %118 by %c1_i32_72 dim 0 : vector<32x128xf32>, i32 -> vector<32x128xf32>
    %cst_73 = arith.constant 0.000000e+00 : f32
    %139 = vector.broadcast %cst_73 : f32 to vector<32x128xf32>
    %140 = arith.select %137, %139, %138 : vector<32x128xi1>, vector<32x128xf32>
    %c15_i32_74 = arith.constant 15 : i32
    %141 = vector.broadcast %c15_i32_74 : i32 to vector<32x128xi32>
    %142 = arith.cmpi eq, %135, %141 : vector<32x128xi32>
    %c31_i32_75 = arith.constant 31 : i32
    %143 = tpu.dynamic_rotate %118 by %c31_i32_75 dim 0 : vector<32x128xf32>, i32 -> vector<32x128xf32>
    %cst_76 = arith.constant 0.000000e+00 : f32
    %144 = vector.broadcast %cst_76 : f32 to vector<32x128xf32>
    %145 = arith.select %142, %144, %143 : vector<32x128xi1>, vector<32x128xf32>
    %146 = arith.truncf %140 : vector<32x128xf32> to vector<32x128xbf16>
    %c0_77 = arith.constant 0 : index
    %c0_78 = arith.constant 0 : index
    %c0_79 = arith.constant 0 : index
    %147 = vector.load %arg14[%c0_77, %c0_78, %c0_79] : memref<3x128x128xbf16, #tpu.memory_space<vmem>>, vector<1x128x128xbf16>
    %148 = vector.shape_cast %147 : vector<1x128x128xbf16> to vector<128x128xbf16>
    %cst_80 = arith.constant dense<0.000000e+00> : vector<32x128xf32>
    %149 = tpu.matmul %146, %148, %cst_80 {dimension_numbers = #tpu.dot_dimension_numbers<[1], [0], [0], [1], [0, 0, 1, 1], [], []>} : vector<32x128xbf16>, vector<128x128xbf16>, vector<32x128xf32> -> vector<32x128xf32>
    %150 = arith.truncf %118 : vector<32x128xf32> to vector<32x128xbf16>
    %c1_81 = arith.constant 1 : index
    %c0_82 = arith.constant 0 : index
    %c0_83 = arith.constant 0 : index
    %151 = vector.load %arg14[%c1_81, %c0_82, %c0_83] : memref<3x128x128xbf16, #tpu.memory_space<vmem>>, vector<1x128x128xbf16>
    %152 = vector.shape_cast %151 : vector<1x128x128xbf16> to vector<128x128xbf16>
    %cst_84 = arith.constant dense<0.000000e+00> : vector<32x128xf32>
    %153 = tpu.matmul %150, %152, %cst_84 {dimension_numbers = #tpu.dot_dimension_numbers<[1], [0], [0], [1], [0, 0, 1, 1], [], []>} : vector<32x128xbf16>, vector<128x128xbf16>, vector<32x128xf32> -> vector<32x128xf32>
    %154 = arith.addf %149, %153 : vector<32x128xf32>
    %155 = arith.truncf %145 : vector<32x128xf32> to vector<32x128xbf16>
    %c2_85 = arith.constant 2 : index
    %c0_86 = arith.constant 0 : index
    %c0_87 = arith.constant 0 : index
    %156 = vector.load %arg14[%c2_85, %c0_86, %c0_87] : memref<3x128x128xbf16, #tpu.memory_space<vmem>>, vector<1x128x128xbf16>
    %157 = vector.shape_cast %156 : vector<1x128x128xbf16> to vector<128x128xbf16>
    %cst_88 = arith.constant dense<0.000000e+00> : vector<32x128xf32>
    %158 = tpu.matmul %155, %157, %cst_88 {dimension_numbers = #tpu.dot_dimension_numbers<[1], [0], [0], [1], [0, 0, 1, 1], [], []>} : vector<32x128xbf16>, vector<128x128xbf16>, vector<32x128xf32> -> vector<32x128xf32>
    %159 = arith.addf %154, %158 : vector<32x128xf32>
    %c0_89 = arith.constant 0 : index
    %c0_90 = arith.constant 0 : index
    %160 = vector.load %arg15[%c0_89, %c0_90] : memref<1x128xf32, #tpu.memory_space<vmem>>, vector<1x128xf32>
    %161 = vector.broadcast %160 : vector<1x128xf32> to vector<32x128xf32>
    %162 = arith.addf %159, %161 : vector<32x128xf32>
    %163 = arith.truncf %2 : vector<32x64xf32> to vector<32x64xbf16>
    %c0_91 = arith.constant 0 : index
    %c0_92 = arith.constant 0 : index
    %164 = vector.load %arg16[%c0_91, %c0_92] : memref<64x128xbf16, #tpu.memory_space<vmem>>, vector<64x128xbf16>
    %cst_93 = arith.constant dense<0.000000e+00> : vector<32x128xf32>
    %165 = tpu.matmul %163, %164, %cst_93 {dimension_numbers = #tpu.dot_dimension_numbers<[1], [0], [0], [1], [0, 0, 1, 1], [], []>} : vector<32x64xbf16>, vector<64x128xbf16>, vector<32x128xf32> -> vector<32x128xf32>
    %c0_94 = arith.constant 0 : index
    %c0_95 = arith.constant 0 : index
    %166 = vector.load %arg17[%c0_94, %c0_95] : memref<1x128xf32, #tpu.memory_space<vmem>>, vector<1x128xf32>
    %167 = vector.broadcast %166 : vector<1x128xf32> to vector<32x128xf32>
    %168 = arith.addf %165, %167 : vector<32x128xf32>
    %169 = arith.addf %168, %162 : vector<32x128xf32>
    %c0_96 = arith.constant 0 : index
    %c0_97 = arith.constant 0 : index
    %170 = vector.load %arg18[%c0_96, %c0_97] : memref<32x128xf32, #tpu.memory_space<vmem>>, vector<32x128xf32>
    tpu.vector_store %arg18[%c0_96, %c0_97], %169 {strides = array<i32>} : memref<32x128xf32, #tpu.memory_space<vmem>>, vector<32x128xf32>,
    return
  }
  func.func @transform_0(%arg0: i32) -> (i32, i32) {
    %c0_i32 = arith.constant 0 : i32
    %c0_i32_0 = arith.constant 0 : i32
    %c0_i32_1 = arith.constant 0 : i32
    return %c0_i32, %c0_i32_0 : i32, i32
  }
  func.func @transform_1(%arg0: i32) -> (i32, i32) {
    %c0_i32 = arith.constant 0 : i32
    %c0_i32_0 = arith.constant 0 : i32
    %c0_i32_1 = arith.constant 0 : i32
    return %c0_i32, %c0_i32_0 : i32, i32
  }
  func.func @transform_2(%arg0: i32) -> (i32, i32) {
    %c0_i32 = arith.constant 0 : i32
    %c0_i32_0 = arith.constant 0 : i32
    %c0_i32_1 = arith.constant 0 : i32
    return %c0_i32, %c0_i32_0 : i32, i32
  }
  func.func @transform_3(%arg0: i32) -> (i32, i32) {
    %c0_i32 = arith.constant 0 : i32
    %c0_i32_0 = arith.constant 0 : i32
    %c0_i32_1 = arith.constant 0 : i32
    return %c0_i32, %c0_i32_0 : i32, i32
  }
  func.func @transform_4(%arg0: i32) -> (i32, i32) {
    %c0_i32 = arith.constant 0 : i32
    %c0_i32_0 = arith.constant 0 : i32
    %c0_i32_1 = arith.constant 0 : i32
    return %c0_i32, %c0_i32_0 : i32, i32
  }
  func.func @transform_5(%arg0: i32) -> (i32, i32) {
    %c0_i32 = arith.constant 0 : i32
    %c0_i32_0 = arith.constant 0 : i32
    %c0_i32_1 = arith.constant 0 : i32
    return %c0_i32, %c0_i32_0 : i32, i32
  }
  func.func @transform_6(%arg0: i32) -> (i32, i32) {
    %c0_i32 = arith.constant 0 : i32
    %c0_i32_0 = arith.constant 0 : i32
    %c0_i32_1 = arith.constant 0 : i32
    return %c0_i32, %c0_i32_0 : i32, i32
  }
  func.func @transform_7(%arg0: i32) -> (i32, i32) {
    %c0_i32 = arith.constant 0 : i32
    %c0_i32_0 = arith.constant 0 : i32
    %c0_i32_1 = arith.constant 0 : i32
    return %c0_i32, %c0_i32_0 : i32, i32
  }
  func.func @transform_8(%arg0: i32) -> (i32, i32) {
    %c0_i32 = arith.constant 0 : i32
    %c0_i32_0 = arith.constant 0 : i32
    %c0_i32_1 = arith.constant 0 : i32
    return %c0_i32, %c0_i32_0 : i32, i32
  }
  func.func @transform_9(%arg0: i32) -> (i32, i32, i32) {
    %c0_i32 = arith.constant 0 : i32
    %c0_i32_0 = arith.constant 0 : i32
    %c0_i32_1 = arith.constant 0 : i32
    %c0_i32_2 = arith.constant 0 : i32
    return %c0_i32, %c0_i32_0, %c0_i32_1 : i32, i32, i32
  }
  func.func @transform_10(%arg0: i32) -> (i32, i32) {
    %c0_i32 = arith.constant 0 : i32
    %c0_i32_0 = arith.constant 0 : i32
    %c0_i32_1 = arith.constant 0 : i32
    return %c0_i32, %c0_i32_0 : i32, i32
  }
  func.func @transform_11(%arg0: i32) -> (i32, i32) {
    %c0_i32 = arith.constant 0 : i32
    %c0_i32_0 = arith.constant 0 : i32
    %c0_i32_1 = arith.constant 0 : i32
    return %c0_i32, %c0_i32_0 : i32, i32
  }
  func.func @transform_12(%arg0: i32) -> (i32, i32) {
    %c0_i32 = arith.constant 0 : i32
    %c0_i32_0 = arith.constant 0 : i32
    %c0_i32_1 = arith.constant 0 : i32
    return %c0_i32, %c0_i32_0 : i32, i32
  }
  func.func @transform_13(%arg0: i32) -> (i32, i32, i32) {
    %c0_i32 = arith.constant 0 : i32
    %c0_i32_0 = arith.constant 0 : i32
    %c0_i32_1 = arith.constant 0 : i32
    %c0_i32_2 = arith.constant 0 : i32
    return %c0_i32, %c0_i32_0, %c0_i32_1 : i32, i32, i32
  }
  func.func @transform_14(%arg0: i32) -> (i32, i32) {
    %c0_i32 = arith.constant 0 : i32
    %c0_i32_0 = arith.constant 0 : i32
    %c0_i32_1 = arith.constant 0 : i32
    return %c0_i32, %c0_i32_0 : i32, i32
  }
  func.func @transform_15(%arg0: i32) -> (i32, i32) {
    %c0_i32 = arith.constant 0 : i32
    %c0_i32_0 = arith.constant 0 : i32
    %c0_i32_1 = arith.constant 0 : i32
    return %c0_i32, %c0_i32_0 : i32, i32
  }
  func.func @transform_16(%arg0: i32) -> (i32, i32) {
    %c0_i32 = arith.constant 0 : i32
    %c0_i32_0 = arith.constant 0 : i32
    %c0_i32_1 = arith.constant 0 : i32
    return %c0_i32, %c0_i32_0 : i32, i32
  }
  func.func @transform_17(%arg0: i32) -> (i32, i32) {
    %c0_i32 = arith.constant 0 : i32
    %c0_i32_0 = arith.constant 0 : i32
    %c0_i32_1 = arith.constant 0 : i32
    return %c0_i32, %c0_i32_0 : i32, i32
  }
}

</mosaic_0001>

<bundles_post_ra>
// kernel: tpu_custom_call.1
= control target key start
LH: loop header
LB: loop body
LE: loop exit
PB: predicated region body
PF: predicated region fallthrough
CT: control target
= control target key end

     0   :  { %s3858_s0 = inlined_call_operand.vmem [shape: f32[32,64], index: 0, kind: input, shape index: {}]   ;;  %s3859_s1 = inlined_call_operand.vmem [shape: f32[2,32], index: 1, kind: input, shape index: {}]   ;;  %s3860_s2 = inlined_call_operand.vmem [shape: f32[32,2], index: 2, kind: input, shape index: {}]   ;;  %s3861_s3 = inlined_call_operand.vmem [shape: f32[64,4], index: 3, kind: input, shape index: {}]   ;;  %s3862_s4 = inlined_call_operand.vmem [shape: f32[4,64], index: 4, kind: input, shape index: {}]   ;;  %s3863_s5 = inlined_call_operand.vmem [shape: f32[128,4], index: 5, kind: input, shape index: {}]   ;;  %s3864_s6 = inlined_call_operand.vmem [shape: f32[4,128], index: 6, kind: input, shape index: {}]   ;;  %s3865_s7 = inlined_call_operand.vmem [shape: f32[1,64], index: 7, kind: input, shape index: {}]   ;;  %s3866_s8 = inlined_call_operand.vmem [shape: f32[1,64], index: 8, kind: input, shape index: {}]   ;;  %s3867_s9 = inlined_call_operand.hbm [shape: bf16[3,64,128], index: 9, kind: input, shape index: {}]   ;;  %s3868_s10 = inlined_call_operand.vmem [shape: f32[1,128], index: 10, kind: input, shape index: {}]   ;;  %s3869_s11 = inlined_call_operand.vmem [shape: f32[1,128], index: 11, kind: input, shape index: {}]   ;;  %s3870_s12 = inlined_call_operand.vmem [shape: f32[1,128], index: 12, kind: input, shape index: {}]   ;;  %s3871_s13 = inlined_call_operand.vmem [shape: bf16[3,128,128], index: 13, kind: input, shape index: {}]   ;;  %s3872_s14 = inlined_call_operand.vmem [shape: f32[1,128], index: 14, kind: input, shape index: {}]   ;;  %s3873_s15 = inlined_call_operand.vmem [shape: bf16[64,128], index: 15, kind: input, shape index: {}]   ;;  %s3874_s16 = inlined_call_operand.vmem [shape: f32[1,128], index: 16, kind: input, shape index: {}]   ;;  %s3875_s17 = inlined_call_operand.hbm [shape: f32[32,128], index: 17, kind: output, shape index: {}]  }
   0x1   :  { %3877 = sst [smem:[#allocation8_spill]] %s3858_s0 }
   0x2   :  { %3878 = sst [smem:[#allocation9_spill]] %s3859_s1 }
   0x3   :  { %22 = vsyncpa [#allocation3], 0 }
   0x4   :  { %23 = vsyncpa [#allocation4], 0  ;;  %s3229_s24 = smov [#allocation2]   ;;  %s3181_s28 = scalar_lea.hbm %s3867_s9, 1536 }
   0x5   :  { %s47_s25 = sshll.u32 %s3229_s24, 4  ;;  %p3182_p0 = scmp.ne.s32.totalorder %s3867_s9, %s3181_s28  ;;  %s48_s25 = int_to_ptr.vmem [resolvable:$true] %s47_s25 }
   0x6   :  { %p3185_p1 = scmp.lt.u32.totalorder %s3181_s28, %s3867_s9 }
   0x8   :  { %p3187_p2 = pnand %p3185_p1, %p3182_p0 }
   0xa   :  { %3190 = shalt.err (!%p3187_p2)
}
   0xb   :  { %s3191_s19 = scalar_lea.vmem %s48_s25, 1536  ;;  %p3196_p4 = scmp.lt.s32.totalorder %s48_s25, %s48_s25 }
   0xc   :  { %p3192_p3 = scmp.ne.s32.totalorder %s48_s25, %s3191_s19  ;;  %p3197_p5 = scmp.lt.s32.totalorder %s3191_s19, %s3191_s19 }
   0xe   :  { %p3198_p6 = por %p3197_p5, %p3196_p4 }
  0x10   :  { %p3199_p7 = pnand %p3198_p6, %p3192_p3 }
  0x12   :  { %3202 = shalt.err (!%p3199_p7)
}
  0x13   :  { %s3230_s1 = smov 64   ;;  %s3231_s20 = smov 4  }
  0x14   :  { %53 = dma.hbm_to_vmem [thread:$0]  %s3867_s9, 1536, %s48_s25, [#allocation3], %s3230_s1, %s3230_s1, %s3231_s20  }
  0x15   :  { %3225 = dma.done.wait [#allocation3], 1536  }
  0x16   :  { %3226 = vsyncadd [#allocation3], 4294965760  ;;  %v3232_v0 = vmov 0.0|0.0   ;;  %vm3233_vm0 = vmmov 0   ;;  %v3234_v1 = vmov 0.0   ;;  %s3879_s26 = sld [smem:[#allocation8_spill]] }
  0x17   :  { %2971 = vmatprep.subr.bf16.mxu1 %v3232_v0  ;;  %2667 = vmatprep.mubr.msk.f32.mxu1 %vm3233_vm0, %v3234_v1  ;;  %vm81_vm1 = vcmask 261120   ;;  %s3880_s19 = sld [smem:[#allocation9_spill]]  ;;  %v229_v14 = vld [vmem:[%s3861_s3] sm:$0xff]  ;;  %v230_v15 = vld [vmem:[%s3861_s3 + $0x8] sm:$0xff]  ;;  %v231_v17 = vld [vmem:[%s3861_s3 + $0x10] sm:$0xff]  ;;  %vm237_vm2 = vcmask 523264  }
  0x18   :  { %2719 = vmatprep.subr.mxu0 %v3234_v1  ;;  %2721 = vmatprep.mubr.msk.f32.mxu0 %vm3233_vm0, %v3234_v1  ;;  %v232_v18 = vld [vmem:[%s3861_s3 + $0x18] sm:$0xff]  ;;  %v2984_v19 = vpack.c.bf16 %v230_v15, %v229_v14  ;;  %v233_v20 = vld [vmem:[%s3861_s3 + $0x20] sm:$0xff]  ;;  %v234_v21 = vld [vmem:[%s3861_s3 + $0x28] sm:$0xff]  ;;  %vm396_vm3 = vcmask 1043456   ;;  %vm392_vm4 = vcmask 31744   ;;  %vm470_vm5 = vcmask 15360  }
  0x19   :  { %v2987_v22 = vpack.c.bf16 %v232_v18, %v231_v17  ;;  %v235_v23 = vld [vmem:[%s3861_s3 + $0x30] sm:$0xff]  ;;  %v236_v24 = vld [vmem:[%s3861_s3 + $0x38] sm:$0xff]  ;;  %v2990_v25 = vpack.c.bf16 %v234_v21, %v233_v20  ;;  %v391_v31 = vld [vmem:[%s3862_s4] sm:$0xf]  ;;  %vm483_vm6 = vcmask 1041408   ;;  %vm3235_vm14 = vmmov 1  }
  0x1a   :  { %v2993_v26 = vpack.c.bf16 %v236_v24, %v235_v23  ;;  %2720 = vmatpush3.msk.msra.mxu0 %vm396_vm3, %v391_v31  ;;  %v3450_v43 = vld [vmem:[%s3860_s2] sm:$0xff]  ;;  %v3459_v45 = vld [vmem:[%s3860_s2 + $0x8] sm:$0xff]  ;;  %v3465_v47 = vld [vmem:[%s3860_s2 + $0x10] sm:$0xff]  ;;  %s3236_s29 = smov [#allocation5]  }
  0x1b   :  { %2732 = vmatprep.subr.mxu0 %v3234_v1  ;;  %v3475_v48 = vld [vmem:[%s3860_s2 + $0x18] sm:$0xff]  ;;  %v3105_v51 = vld [vmem:[#allocation2 + $0x20] sm:$0xff]   ;;  %v3106_v52 = vld [vmem:[#allocation2 + $0x28] sm:$0xff]   ;;  %s2348_s0 = sshll.u32 %s3236_s29, 4  ;;  %s2349_s0 = int_to_ptr.vmem [resolvable:$true] %s2348_s0 }
  0x1c   :  { %v3350_v2 = vld [vmem:[%s3879_s26] sm:$0xff]  ;;  %v3355_v3 = vld [vmem:[%s3879_s26 + $0x8] sm:$0xff]  ;;  %v3360_v4 = vld [vmem:[%s3879_s26 + $0x10] sm:$0xff]  ;;  %p3208_p9 = scmp.lt.s32.totalorder %s2349_s0, %s2349_s0 }
  0x1d   :  { %v3364_v5 = vpack.c.bf16 %v3355_v3, %v3350_v2  ;;  %v3369_v6 = vld [vmem:[%s3879_s26 + $0x18] sm:$0xff]  ;;  %v155_v7 = vmul.f32 %v3350_v2, %v3350_v2  ;;  %v156_v8 = vmul.f32 %v3355_v3, %v3355_v3  ;;  %v3384_v10 = vld [vmem:[%s3880_s19] sm:$0x3]  ;;  %v157_v11 = vmul.f32 %v3360_v4, %v3360_v4  ;;  %v3107_v53 = vld [vmem:[#allocation2 + $0x30] sm:$0xff]  }
  0x1e   :  { %v3378_v9 = vpack.c.bf16 %v3369_v6, %v3360_v4  ;;  %v158_v12 = vmul.f32 %v3369_v6, %v3369_v6  ;;  %v3108_v54 = vld [vmem:[#allocation2 + $0x38] sm:$0xff]   ;;  %v3490_v55 = vld [vmem:[#allocation2] sm:$0xff]  }
  0x1f   :  { %2973 = vmatpush3.bf16.msra.mxu1 %v3364_v5  ;;  %v2978_v13 = vpack.c.bf16 %v156_v8, %v155_v7  ;;  %v2378_v63 = vld [vmem:[%s3865_s7] ss:$0 sm:$0xff] }
  0x20   :  { %2974 = vmatprep.subr.bf16.mxu1 %v3232_v0  ;;  %v2981_v16 = vpack.c.bf16 %v158_v12, %v157_v11  ;;  %v2379_v12 = vld [vmem:[%s3866_s8] ss:$0 sm:$0xff] }
  0x23   :  { %2976 = vmatpush3.bf16.msra.mxu1 %v3378_v9 }
  0x24   :  { %2977 = vmatprep.subr.bf16.mxu1 %v3232_v0 }
  0x26   :  { %2668 = vmatmul.mubr.msk.f32.vlgmr.msra.gmra.mrb[0].mxu1 %vm81_vm1, %v3384_v10 }
  0x27   :  { %2979 = vmatpush3.bf16.msra.mxu1 %v2978_v13  ;;  %2678 = vmatprep.mubr.msk.f32.mxu1 %vm3233_vm0, %v3234_v1 }
  0x28   :  { %2980 = vmatprep.subr.bf16.mxu1 %v3232_v0 }
  0x2b   :  { %2982 = vmatpush3.bf16.msra.mxu1 %v2981_v16 }
  0x2c   :  { %2983 = vmatprep.subr.bf16.mxu1 %v3232_v0 }
  0x2e   :  { %2679 = vmatmul.mubr.msk.f32.vlgmr.msra.gmra.mrb[2].mxu1 %vm81_vm1, %v3384_v10 }
  0x2f   :  { %2985 = vmatpush3.bf16.msra.mxu1 %v2984_v19  ;;  %2697 = vmatprep.mubr.msk.f32.mxu1 %vm3233_vm0, %v3234_v1 }
  0x30   :  { %2986 = vmatprep.subr.bf16.mxu1 %v3232_v0 }
  0x33   :  { %2988 = vmatpush3.bf16.msra.mxu1 %v2987_v22 }
  0x34   :  { %2989 = vmatprep.subr.bf16.mxu1 %v3232_v0 }
  0x37   :  { %2991 = vmatpush3.bf16.msra.mxu1 %v2990_v25 }
  0x38   :  { %2992 = vmatprep.subr.bf16.mxu1 %v3232_v0 }
  0x3b   :  { %2994 = vmatpush3.bf16.msra.mxu1 %v2993_v26 }
  0x3c   :  { %2995 = vmatprep.subr.bf16.mxu1 %v3232_v0 }
  0xf9   :  { %v151_v27 = vpop.f32.mrb[0].mxu1 }
  0xfa   :  { %v2669_v28 = vpop.f32.mrb[1].mxu1  ;;  %2698 = vmatmul.mubr.msk.f32.vlgmr.msra.gmra.mrb[4].mxu1 %vm237_vm2, %v151_v27 }
  0xfb   :  { %2997 = vmatpush3.bf16.msra.mxu1 %v2984_v19  ;;  %2716 = vmatprep.mubr.msk.f32.mxu1 %vm3233_vm0, %v3234_v1 }
  0xfc   :  { %2998 = vmatprep.subr.bf16.mxu1 %v3232_v0 }
  0xff   :  { %3000 = vmatpush3.bf16.msra.mxu1 %v2987_v22 }
 0x100   :  { %3001 = vmatprep.subr.bf16.mxu1 %v3232_v0 }
 0x101   :  { %v225_v29 = vpop.f32.mrb[2].mxu1 }
 0x102   :  { %v2680_v30 = vpop.f32.mrb[3].mxu1 }
 0x103   :  { %3003 = vmatpush3.bf16.msra.mxu1 %v2990_v25 }
 0x104   :  { %3004 = vmatprep.subr.bf16.mxu1 %v3232_v0 }
 0x107   :  { %3006 = vmatpush3.bf16.msra.mxu1 %v2993_v26 }
 0x10a   :  { %2717 = vmatmul.mubr.msk.f32.vlgmr.msra.gmra.mrb[6].mxu1 %vm237_vm2, %v225_v29 }
 0x10b   :  { %2726 = vmatprep.mubr.msk.f32.mxu1 %vm470_vm5, %v3450_v43 }
 0x1cd   :  { %v307_v32 = vpop.f32.mrb[4].mxu1 }
 0x1ce   :  { %v384_v33 = vmul.f32 0.00390625, %v307_v32  ;;  %v2699_v34 = vpop.f32.mrb[5].mxu1  ;;  %v791_v32 = vlaneseq }
 0x1d0   :  { %2722 = vmatmul.mubr.msk.f32.vlgmr.msra.gmra.mrb[0].mxu0 %vm392_vm4, %v384_v33  ;;  %v386_v36 = vmul.f32 %v384_v33, %v384_v33 }
 0x1d1   :  { %2733 = vmatpush3.msk.msra.mxu0 %vm396_vm3, %v391_v31  ;;  %2734 = vmatprep.mubr.msk.f32.mxu0 %vm3233_vm0, %v3234_v1 }
 0x1dd   :  { %v380_v35 = vpop.f32.mrb[6].mxu1 }
 0x1de   :  { %v385_v37 = vmul.f32 0.00390625, %v380_v35  ;;  %v2718_v38 = vpop.f32.mrb[7].mxu1 }
 0x1e0   :  { %v387_v39 = vsub.f32 %v385_v37, %v386_v36  ;;  %v3503_v36 = vshrl.u32 %v791_v32, 7  ;;  %v3115_v32 = vld [vmem:[#allocation2 + $0x50] sm:$0xff]  }
 0x1e2   :  { %v388_v40 = vmax.f32 %v387_v39, 0.0  ;;  %v794_v37 = vadd.s32 16, %v3503_v36  ;;  %v793_v39 = vadd.s32 8, %v3503_v36  ;;  %vm852_vm7 = vcmp.lt.s32.totalorder %v3503_v36, 1 }
 0x1e3   :  { %vm869_vm8 = vcmp.lt.s32.totalorder %v3503_v36, 7 }
 0x1e4   :  { %v389_v41 = vadd.f32 1e-06, %v388_v40 }
 0x1e6   :  { %3145 = vrsqrt.f32 %v389_v41 }
 0x1f0   :  { %v3146_v42 = vpop.eup %3145 }
 0x1f1   :  { %2735 = vmatmul.mubr.msk.f32.vlgmr.msra.gmra.mrb[2].mxu0 %vm392_vm4, %v3146_v42  ;;  %v795_v42 = vadd.s32 24, %v3503_v36 }
 0x1f2   :  { %2739 = vmatprep.mubr.msk.f32.mxu0 %vm470_vm5, %v3450_v43 }
 0x2a3   :  { %v466_v44 = vpop.f32.mrb[0].mxu0 }
 0x2a4   :  { %v2723_v46 = vpop.f32.mrb[1].mxu0  ;;  %2724 = vmatprep.subr.msk.mxu1 %vm483_vm6, %v466_v44 }
 0x2a5   :  { %2725 = vmatpush3.msk.msra.mxu1 %vm483_vm6, %v466_v44 }
 0x2a6   :  { %2727 = vmatmul.mubr.msk.f32.vlgmr.msra.gmra.mrb[8].mxu1 %vm470_vm5, %v3459_v45  ;;  %2745 = vmatprep.subr.bf16.mxu1 %v3105_v51 }
 0x2a7   :  { %2729 = vmatprep.mubr.msk.f32.mxu1 %vm470_vm5, %v3465_v47  ;;  %2746 = vmatpush3.bf16.msra.mxu1 %v3105_v51  ;;  %v814_v51 = vand.u32 15, %v794_v37  ;;  %v1308_v37 = vld [vmem:[%s3863_s5 + $0x10] sm:$0xff] }
 0x2a8   :  { %2747 = vmatprep.subr.bf16.mxu1 %v3106_v52 }
 0x2a9   :  { %vm3520_vm10 = vcmp.eq.s32.totalorder %v814_v51, 0  ;;  %v1314_v51 = vld [vmem:[%s3863_s5 + $0x40] sm:$0xff] }
 0x2aa   :  { %2730 = vmatmul.mubr.msk.f32.gmra.mrb[10].mxu1 %vm470_vm5, %v3475_v48 }
 0x2ab   :  { %2748 = vmatpush3.bf16.msra.mxu1 %v3106_v52 }
 0x2ac   :  { %2749 = vmatprep.subr.bf16.mxu1 %v3107_v53 }
 0x2af   :  { %2750 = vmatpush3.bf16.msra.mxu1 %v3107_v53 }
 0x2b0   :  { %2751 = vmatprep.subr.bf16.mxu1 %v3108_v54 }
 0x2b3   :  { %2752 = vmatpush3.bf16.msra.mxu1 %v3108_v54 }
 0x2b4   :  { %2757 = vmatprep.subr.bf16.mxu1 %v3490_v55 }
 0x2c4   :  { %v641_v49 = vpop.f32.mrb[2].mxu0 }
 0x2c5   :  { %v2736_v50 = vpop.f32.mrb[3].mxu0  ;;  %2737 = vmatprep.subr.msk.mxu0 %vm483_vm6, %v641_v49 }
 0x2c6   :  { %2738 = vmatpush3.msk.msra.mxu0 %vm483_vm6, %v641_v49  ;;  %v800_v50 = vand.u32 15, %v3503_v36  ;;  %v3129_v36 = vld [vmem:[%s3871_s13 + $0x20] sm:$0xff]  }
 0x2c7   :  { %2740 = vmatmul.mubr.msk.f32.vlgmr.msra.gmra.mrb[4].mxu0 %vm470_vm5, %v3459_v45  ;;  %3007 = vmatprep.subr.bf16.mxu0 %v3232_v0 }
 0x2c8   :  { %2742 = vmatprep.mubr.msk.f32.mxu0 %vm470_vm5, %v3465_v47  ;;  %vm3516_vm9 = vcmp.eq.s32.totalorder %v800_v50, 0 }
 0x2c9   :  { %vm2457_vm13 = vmneg %vm3516_vm9 }
 0x2ca   :  { %vm2458_vm15 = vmpackc.low %vm3235_vm14, %vm2457_vm13 }
 0x2cb   :  { %2743 = vmatmul.mubr.msk.f32.gmra.mrb[6].mxu0 %vm470_vm5, %v3475_v48 }
 0x2cc   :  { %2789 = vmatprep.mubr.msk.f32.mxu0 %vm3233_vm0, %v3234_v1 }
 0x379   :  { %v2728_v56 = vpop.f32.mrb[8].mxu1 }
 0x37a   :  { %v553_v57 = vpop.f32.mrb[9].mxu1  ;;  %v734_v60 = vsub.f32 %v3355_v3, %v2728_v56 }
 0x37b   :  { %v733_v61 = vsub.f32 %v3350_v2, %v553_v57  ;;  %v807_v57 = vand.u32 15, %v793_v39  ;;  %v1309_v39 = vld [vmem:[%s3863_s5 + $0x18] sm:$0xff] }
 0x37d   :  { %v2731_v58 = vpop.f32.mrb[10].mxu1  ;;  %vm3524_vm11 = vcmp.eq.s32.totalorder %v807_v57, 15 }
 0x37e   :  { %v563_v59 = vpop.f32.mrb[11].mxu1  ;;  %v736_v8 = vsub.f32 %v3369_v6, %v2731_v58 }
 0x37f   :  { %v735_v14 = vsub.f32 %v3360_v4, %v563_v59 }
 0x39a   :  { %v2741_v62 = vpop.f32.mrb[4].mxu0 }
 0x39b   :  { %v738_v7 = vmul.f32 %v2741_v62, %v734_v60  ;;  %v714_v11 = vpop.f32.mrb[5].mxu0  ;;  %v821_v60 = vand.u32 15, %v795_v42  ;;  %v1311_v42 = vld [vmem:[%s3863_s5 + $0x28] sm:$0xff] }
 0x39c   :  { %v737_v13 = vmul.f32 %v733_v61, %v714_v11 }
 0x39d   :  { %v749_v15 = vmul.f32 %v2378_v63, %v738_v7  ;;  %vm3530_vm12 = vcmp.eq.s32.totalorder %v821_v60, 15 }
 0x39e   :  { %v748_v3 = vmul.f32 %v2378_v63, %v737_v13  ;;  %v2744_v16 = vpop.f32.mrb[6].mxu0 }
 0x39f   :  { %v760_v2 = vadd.f32 %v2379_v12, %v749_v15  ;;  %v740_v17 = vmul.f32 %v2744_v16, %v736_v8  ;;  %v724_v18 = vpop.f32.mrb[7].mxu0  ;;  %v3136_v16 = vld [vmem:[%s3871_s13 + $0x98] sm:$0xff]  }
 0x3a0   :  { %v759_v19 = vadd.f32 %v2379_v12, %v748_v3  ;;  %v739_v20 = vmul.f32 %v735_v14, %v724_v18  ;;  %v3110_v3 = vld [vmem:[#allocation2 + $0x8] sm:$0xff]  }
 0x3a1   :  { %v2381_v21 = vmul.f32 -1.442695, %v760_v2  ;;  %v751_v22 = vmul.f32 %v2378_v63, %v740_v17  ;;  %v3143_v17 = vld [vmem:[%s3873_s15 + $0x10] sm:$0xff]  }
 0x3a2   :  { %v2380_v23 = vmul.f32 -1.442695, %v759_v19  ;;  %v750_v6 = vmul.f32 %v2378_v63, %v739_v20 }
 0x3a3   :  { %3147 = vpow2.f32 %v2381_v21  ;;  %v762_v24 = vadd.f32 %v2379_v12, %v751_v22 }
 0x3a4   :  { %3149 = vpow2.f32 %v2380_v23  ;;  %v761_v25 = vadd.f32 %v2379_v12, %v750_v6  ;;  %v3135_v12 = vld [vmem:[%s3871_s13 + $0x90] sm:$0xff]  }
 0x3a5   :  { %v2383_v26 = vmul.f32 -1.442695, %v762_v24 }
 0x3a6   :  { %v2382_v27 = vmul.f32 -1.442695, %v761_v25 }
 0x3a7   :  { %3151 = vpow2.f32 %v2383_v26  ;;  %v3111_v26 = vld [vmem:[#allocation2 + $0x10] sm:$0xff]  }
 0x3a8   :  { %3153 = vpow2.f32 %v2382_v27 }
 0x3ad   :  { %v3148_v4 = vpop.eup %3147 }
 0x3ae   :  { %v3150_v28 = vpop.eup %3149  ;;  %v776_v29 = vadd.f32 1.0, %v3148_v4 }
 0x3af   :  { %v775_v30 = vadd.f32 1.0, %v3150_v28 }
 0x3b0   :  { %3155 = vrcp.f32 %v776_v29  ;;  %v3112_v29 = vld [vmem:[#allocation2 + $0x18] sm:$0xff]  }
 0x3b1   :  { %v3152_v31 = vpop.eup %3151  ;;  %3157 = vrcp.f32 %v775_v30  ;;  %v3113_v30 = vld [vmem:[#allocation2 + $0x40] sm:$0xff]  }
 0x3b2   :  { %v3154_v33 = vpop.eup %3153  ;;  %v778_v34 = vadd.f32 1.0, %v3152_v31  ;;  %v3114_v31 = vld [vmem:[#allocation2 + $0x48] sm:$0xff]  }
 0x3b3   :  { %v777_v35 = vadd.f32 1.0, %v3154_v33  ;;  %v3116_v33 = vld [vmem:[#allocation2 + $0x58] sm:$0xff]  }
 0x3b4   :  { %3159 = vrcp.f32 %v778_v34  ;;  %v1306_v34 = vld [vmem:[%s3863_s5] sm:$0xff] }
 0x3b5   :  { %3161 = vrcp.f32 %v777_v35  ;;  %v1307_v35 = vld [vmem:[%s3863_s5 + $0x8] sm:$0xff] }
 0x3ba   :  { %v3156_v38 = vpop.eup %3155 }
 0x3bb   :  { %v3158_v40 = vpop.eup %3157  ;;  %v788_v41 = vmul.f32 %v3156_v38, %v760_v2  ;;  %v3570_v38 = vpack.c.bf16 %v1307_v35, %v1306_v34 }
 0x3bc   :  { %v787_v44 = vmul.f32 %v3158_v40, %v759_v19  ;;  %v3576_v40 = vpack.c.bf16 %v1309_v39, %v1308_v37 }
 0x3bd   :  { %v849_v46 = vrot.slane %v788_v41, 7  ;;  %v866_v49 = vrot.slane %v788_v41, 1 }
 0x3be   :  { %v3160_v52 = vpop.eup %3159  ;;  %v848_v53 = vrot.slane %v787_v44, 7  ;;  %v865_v54 = vrot.slane %v787_v44, 1  ;;  %v888_v56 = vpack.c.bf16 %v788_v41, %v787_v44  ;;  %v1310_v41 = vld [vmem:[%s3863_s5 + $0x20] sm:$0xff] }
 0x3bf   :  { %v3162_v58 = vpop.eup %3161  ;;  %v790_v59 = vmul.f32 %v3160_v52, %v762_v24  ;;  %v3586_v44 = vpack.c.bf16 %v1311_v42, %v1310_v41  ;;  %v1315_v52 = vld [vmem:[%s3863_s5 + $0x48] sm:$0xff] }
 0x3c0   :  { %v789_v61 = vmul.f32 %v3162_v58, %v761_v25  ;;  %2753 = vmatprep.mubr.msk.bf16.mxu1 %vm237_vm2, %v888_v56  ;;  %v855_v62 = vsel %vm852_vm7, %v848_v53, %v849_v46  ;;  %v872_v63 = vsel %vm869_vm8, %v865_v54, %v866_v49  ;;  %v1317_v56 = vld [vmem:[%s3863_s5 + $0x58] sm:$0xff]  ;;  %v1318_v58 = vld [vmem:[%s3863_s5 + $0x60] sm:$0xff] }
 0x3c1   :  { %v851_v7 = vrot.slane %v790_v59, 7  ;;  %v868_v8 = vrot.slane %v790_v59, 1 }
 0x3c2   :  { %v850_v13 = vrot.slane %v789_v61, 7  ;;  %v867_v14 = vrot.slane %v789_v61, 1  ;;  %v889_v15 = vpack.c.bf16 %v790_v59, %v789_v61  ;;  %v1319_v59 = vld [vmem:[%s3863_s5 + $0x68] sm:$0xff]  ;;  %v1320_v61 = vld [vmem:[%s3863_s5 + $0x70] sm:$0xff] }
 0x3c3   :  { %v856_v2 = vsel %vm852_vm7, %v851_v7, %v848_v53  ;;  %v873_v18 = vsel %vm869_vm8, %v868_v8, %v865_v54  ;;  %v3032_v53 = vpack.c.bf16 %v1315_v52, %v1314_v51  ;;  %v1316_v54 = vld [vmem:[%s3863_s5 + $0x50] sm:$0xff]  ;;  %v3038_v60 = vpack.c.bf16 %v1319_v59, %v1318_v58  ;;  %v3122_v52 = vld [vmem:[%s3871_s13 + $0x68] sm:$0xff]  }
 0x3c4   :  { %2754 = vmatmul.mubr.msk.bf16.vlgmr.msra.gmra.mrb[12].mxu1 %vm237_vm2, %v889_v15  ;;  %v857_v19 = vsel %vm3516_vm9, 0.0, %v856_v2  ;;  %v853_v20 = vsel %vm852_vm7, %v850_v13, %v851_v7  ;;  %v854_v21 = vsel %vm852_vm7, %v849_v46, %v850_v13  ;;  %v871_v22 = vsel %vm869_vm8, %v866_v49, %v867_v14  ;;  %v1312_v46 = vld [vmem:[%s3863_s5 + $0x30] sm:$0xff]  ;;  %v1313_v49 = vld [vmem:[%s3863_s5 + $0x38] sm:$0xff] }
 0x3c5   :  { %2758 = vmatpush3.bf16.msra.mxu1 %v3490_v55  ;;  %v878_v23 = vpack.c.bf16 %v855_v62, %v857_v19  ;;  %v859_v6 = vsel %vm3520_vm10, 0.0, %v854_v21  ;;  %v875_v24 = vsel %vm3524_vm11, 0.0, %v871_v22  ;;  %v870_v25 = vsel %vm869_vm8, %v867_v14, %v868_v8  ;;  %v1321_v62 = vld [vmem:[%s3863_s5 + $0x78] sm:$0xff]  ;;  %v2402_v8 = vld [vmem:[%s3868_s10] ss:$0 sm:$0xff] }
 0x3c6   :  { %2759 = vmatprep.subr.bf16.mxu1 %v3110_v3  ;;  %v879_v27 = vpack.c.bf16 %v853_v20, %v859_v6  ;;  %v1057_v4 = vpack.c.bf16 %v875_v24, %v872_v63  ;;  %v877_v28 = vsel %vm3530_vm12, 0.0, %v873_v18  ;;  %v3596_v50 = vpack.c.bf16 %v1313_v49, %v1312_v46 }
 0x3c7   :  { %2765 = vmatprep.mubr.msk.bf16.mxu1 %vm237_vm2, %v878_v23  ;;  %v1058_v55 = vpack.c.bf16 %v877_v28, %v870_v25  ;;  %v3035_v57 = vpack.c.bf16 %v1317_v56, %v1316_v54  ;;  %v3041_v63 = vpack.c.bf16 %v1321_v62, %v1320_v61  ;;  %v3124_v54 = vld [vmem:[%s3871_s13 + $0x78] sm:$0xff]   ;;  %v3734_v56 = vld [vmem:[%s3871_s13] sm:$0xff]  }
 0x3c9   :  { %2760 = vmatpush3.bf16.msra.mxu1 %v3110_v3 }
 0x3ca   :  { %2761 = vmatprep.subr.bf16.mxu1 %v3111_v26 }
 0x3cd   :  { %2762 = vmatpush3.bf16.msra.mxu1 %v3111_v26 }
 0x3ce   :  { %2763 = vmatprep.subr.bf16.mxu1 %v3112_v29 }
 0x3d1   :  { %2764 = vmatpush3.bf16.msra.mxu1 %v3112_v29 }
 0x3d2   :  { %2769 = vmatprep.subr.bf16.mxu1 %v3113_v30 }
 0x3d4   :  { %2766 = vmatmul.mubr.msk.bf16.vlgmr.msra.gmra.mrb[12].mxu1 %vm237_vm2, %v879_v27 }
 0x3d5   :  { %2770 = vmatpush3.bf16.msra.mxu1 %v3113_v30  ;;  %2777 = vmatprep.mubr.msk.bf16.mxu1 %vm237_vm2, %v1057_v4 }
 0x3d6   :  { %2771 = vmatprep.subr.bf16.mxu1 %v3114_v31 }
 0x3d9   :  { %2772 = vmatpush3.bf16.msra.mxu1 %v3114_v31 }
 0x3da   :  { %2773 = vmatprep.subr.bf16.mxu1 %v3115_v32 }
 0x3dd   :  { %2774 = vmatpush3.bf16.msra.mxu1 %v3115_v32 }
 0x3de   :  { %2775 = vmatprep.subr.bf16.mxu1 %v3116_v33 }
 0x3e1   :  { %2776 = vmatpush3.bf16.msra.mxu1 %v3116_v33 }
 0x3e2   :  { %3019 = vmatprep.subr.bf16.mxu1 %v3232_v0 }
 0x3e4   :  { %2778 = vmatmul.mubr.msk.bf16.vlgmr.msra.gmra.mrb[12].mxu1 %vm237_vm2, %v1058_v55 }
 0x3e5   :  { %2835 = vmatprep.mubr.msk.f32.mxu1 %vm3233_vm0, %v3234_v1  ;;  %3021 = vmatpush3.bf16.msra.mxu1 %v3570_v38 }
 0x3e6   :  { %3022 = vmatprep.subr.bf16.mxu1 %v3232_v0 }
 0x3e9   :  { %3024 = vmatpush3.bf16.msra.mxu1 %v3576_v40 }
 0x3ea   :  { %3025 = vmatprep.subr.bf16.mxu1 %v3232_v0 }
 0x3ed   :  { %3027 = vmatpush3.bf16.msra.mxu1 %v3586_v44 }
 0x3ee   :  { %3028 = vmatprep.subr.bf16.mxu1 %v3232_v0 }
 0x3f1   :  { %3030 = vmatpush3.bf16.msra.mxu1 %v3596_v50 }
 0x3f2   :  { %3031 = vmatprep.subr.bf16.mxu1 %v3232_v0 }
 0x3f5   :  { %3033 = vmatpush3.bf16.msra.mxu1 %v3032_v53 }
 0x3f6   :  { %3034 = vmatprep.subr.bf16.mxu1 %v3232_v0 }
 0x3f9   :  { %3036 = vmatpush3.bf16.msra.mxu1 %v3035_v57 }
 0x3fa   :  { %3037 = vmatprep.subr.bf16.mxu1 %v3232_v0 }
 0x3fd   :  { %3039 = vmatpush3.bf16.msra.mxu1 %v3038_v60 }
 0x3fe   :  { %3040 = vmatprep.subr.bf16.mxu1 %v3232_v0 }
 0x401   :  { %3042 = vmatpush3.bf16.msra.mxu1 %v3041_v63 }
 0x402   :  { %3043 = vmatprep.subr.bf16.mxu1 %v3232_v0 }
 0x4b7   :  { %v2779_v7 = vpop.f32.mrb[12].mxu1 }
 0x4b8   :  { %v1132_v13 = vpop.f32.mrb[13].mxu1  ;;  %v3640_v20 = vadd.f32 %v2779_v7, %v2402_v8 }
 0x4b9   :  { %v2780_v14 = vpop.f32.mrb[14].mxu1  ;;  %v3632_v3 = vadd.f32 %v2402_v8, %v1132_v13 }
 0x4ba   :  { %v1135_v15 = vpop.f32.mrb[15].mxu1  ;;  %v3636_v18 = vadd.f32 %v2780_v14, %v2402_v8  ;;  %v1234_v25 = vmul.f32 %v3640_v20, %v3640_v20 }
 0x4bb   :  { %v3634_v2 = vadd.f32 %v2402_v8, %v1135_v15  ;;  %v1232_v23 = vmul.f32 %v3632_v3, %v3632_v3 }
 0x4bc   :  { %v3011_v21 = vpack.c.bf16 %v3636_v18, %v3640_v20  ;;  %v1235_v6 = vmul.f32 %v3636_v18, %v3636_v18 }
 0x4bd   :  { %v3008_v19 = vpack.c.bf16 %v3634_v2, %v3632_v3  ;;  %v1233_v22 = vmul.f32 %v3634_v2, %v3634_v2 }
 0x4be   :  { %v3017_v26 = vpack.c.bf16 %v1235_v6, %v1234_v25 }
 0x4bf   :  { %3009 = vmatpush3.bf16.msra.mxu0 %v3008_v19  ;;  %v3014_v24 = vpack.c.bf16 %v1233_v22, %v1232_v23 }
 0x4c0   :  { %3010 = vmatprep.subr.bf16.mxu0 %v3232_v0 }
 0x4c3   :  { %3012 = vmatpush3.bf16.msra.mxu0 %v3011_v21 }
 0x4c4   :  { %3013 = vmatprep.subr.bf16.mxu0 %v3232_v0 }
 0x4c6   :  { %2790 = vmatmul.mubr.msk.f32.vlgmr.msra.gmra.mrb[8].mxu0 %vm81_vm1, %v3384_v10 }
 0x4c7   :  { %3015 = vmatpush3.bf16.msra.mxu0 %v3014_v24  ;;  %2800 = vmatprep.mubr.msk.f32.mxu0 %vm3233_vm0, %v3234_v1 }
 0x4c8   :  { %3016 = vmatprep.subr.bf16.mxu0 %v3232_v0 }
 0x4cb   :  { %3018 = vmatpush3.bf16.msra.mxu0 %v3017_v26 }
 0x4cc   :  { %2873 = vmatprep.subr.mxu0 %v3234_v1 }
 0x4ce   :  { %2801 = vmatmul.mubr.msk.f32.vlgmr.msra.gmra.mrb[10].mxu0 %vm81_vm1, %v3384_v10  ;;  %v1469_v10 = vld [vmem:[%s3864_s6] sm:$0xf]  ;;  %vm2489_vm1 = vmneg %vm3524_vm11 }
 0x4cf   :  { %2875 = vmatprep.mubr.msk.f32.mxu0 %vm3233_vm0, %v3234_v1  ;;  %2874 = vmatpush3.msk.msra.mxu0 %vm396_vm3, %v1469_v10 }
 0x599   :  { %v1228_v27 = vpop.f32.mrb[8].mxu0 }
 0x59a   :  { %v2791_v4 = vpop.f32.mrb[9].mxu0  ;;  %2836 = vmatmul.mubr.f32.vlgmr.msra.gmra.mrb[16].mxu1 %v1228_v27 }
 0x59b   :  { %3045 = vmatpush3.bf16.msra.mxu1 %v3570_v38  ;;  %2870 = vmatprep.mubr.msk.f32.mxu1 %vm3233_vm0, %v3234_v1 }
 0x59c   :  { %3046 = vmatprep.subr.bf16.mxu1 %v3232_v0 }
 0x59f   :  { %3048 = vmatpush3.bf16.msra.mxu1 %v3576_v40 }
 0x5a0   :  { %3049 = vmatprep.subr.bf16.mxu1 %v3232_v0 }
 0x5a1   :  { %v1302_v28 = vpop.f32.mrb[10].mxu0 }
 0x5a2   :  { %v2802_v55 = vpop.f32.mrb[11].mxu0 }
 0x5a3   :  { %3051 = vmatpush3.bf16.msra.mxu1 %v3586_v44 }
 0x5a4   :  { %3052 = vmatprep.subr.bf16.mxu1 %v3232_v0 }
 0x5a7   :  { %3054 = vmatpush3.bf16.msra.mxu1 %v3596_v50 }
 0x5a8   :  { %3055 = vmatprep.subr.bf16.mxu1 %v3232_v0 }
 0x5ab   :  { %3057 = vmatpush3.bf16.msra.mxu1 %v3032_v53  ;;  %v3123_v53 = vld [vmem:[%s3871_s13 + $0x70] sm:$0xff]  }
 0x5ac   :  { %3058 = vmatprep.subr.bf16.mxu1 %v3232_v0 }
 0x5af   :  { %3060 = vmatpush3.bf16.msra.mxu1 %v3035_v57 }
 0x5b0   :  { %3061 = vmatprep.subr.bf16.mxu1 %v3232_v0 }
 0x5b3   :  { %3063 = vmatpush3.bf16.msra.mxu1 %v3038_v60  ;;  %v2419_v60 = vld [vmem:[%s3869_s11] ss:$0 sm:$0xff] }
 0x5b4   :  { %3064 = vmatprep.subr.bf16.mxu1 %v3232_v0 }
 0x5b7   :  { %3066 = vmatpush3.bf16.msra.mxu1 %v3041_v63  ;;  %v2420_v63 = vld [vmem:[%s3870_s12] ss:$0 sm:$0xff] }
 0x5ba   :  { %2871 = vmatmul.mubr.f32.vlgmr.msra.gmra.mrb[18].mxu1 %v1302_v28 }
 0x66d   :  { %v1388_v29 = vpop.f32.mrb[16].mxu1 }
 0x66e   :  { %v1462_v30 = vmul.f32 0.001953125, %v1388_v29  ;;  %v2837_v31 = vpop.f32.mrb[17].mxu1 }
 0x670   :  { %2876 = vmatmul.mubr.msk.f32.vlgmr.msra.gmra.mrb[12].mxu0 %vm392_vm4, %v1462_v30  ;;  %v1464_v33 = vmul.f32 %v1462_v30, %v1462_v30 }
 0x671   :  { %2880 = vmatprep.mubr.msk.f32.mxu0 %vm470_vm5, %v3450_v43 }
 0x68d   :  { %v1458_v32 = vpop.f32.mrb[18].mxu1 }
 0x68e   :  { %v1463_v34 = vmul.f32 0.001953125, %v1458_v32  ;;  %v2872_v0 = vpop.f32.mrb[19].mxu1 }
 0x690   :  { %v1465_v35 = vsub.f32 %v1463_v34, %v1464_v33 }
 0x692   :  { %v1466_v37 = vmax.f32 %v1465_v35, 0.0 }
 0x694   :  { %v1467_v38 = vadd.f32 1e-06, %v1466_v37 }
 0x696   :  { %3163 = vrsqrt.f32 %v1467_v38 }
 0x6a0   :  { %v3164_v41 = vpop.eup %3163 }
 0x743   :  { %v1542_v39 = vpop.f32.mrb[12].mxu0 }
 0x744   :  { %v2877_v40 = vpop.f32.mrb[13].mxu0  ;;  %2878 = vmatprep.subr.msk.mxu0 %vm483_vm6, %v1542_v39 }
 0x745   :  { %2879 = vmatpush3.msk.msra.mxu0 %vm483_vm6, %v1542_v39 }
 0x746   :  { %2881 = vmatmul.mubr.msk.f32.vlgmr.msra.gmra.mrb[14].mxu0 %vm470_vm5, %v3459_v45  ;;  %2886 = vmatprep.subr.mxu0 %v3234_v1 }
 0x747   :  { %2883 = vmatprep.mubr.msk.f32.mxu0 %vm470_vm5, %v3465_v47  ;;  %2887 = vmatpush3.msk.msra.mxu0 %vm396_vm3, %v1469_v10 }
 0x74a   :  { %2884 = vmatmul.mubr.msk.f32.gmra.mrb[16].mxu0 %vm470_vm5, %v3475_v48 }
 0x74b   :  { %2888 = vmatprep.mubr.msk.f32.mxu0 %vm3233_vm0, %v3234_v1  ;;  %v3117_v1 = vld [vmem:[%s3871_s13 + $0x40] sm:$0xff]   ;;  %vm2461_vm0 = vmneg %vm3520_vm10 }
 0x74c   :  { %vm2462_vm3 = vmpackc.low %vm3235_vm14, %vm2461_vm0 }
 0x74e   :  { %2889 = vmatmul.mubr.msk.f32.vlgmr.msra.gmra.mrb[18].mxu0 %vm392_vm4, %v3164_v41  ;;  %vm2490_vm4 = vmpackc.low %vm2489_vm1, %vm3235_vm14 }
 0x74f   :  { %2893 = vmatprep.mubr.msk.f32.mxu0 %vm470_vm5, %v3450_v43  ;;  %v3118_v43 = vld [vmem:[%s3871_s13 + $0x48] sm:$0xff]  }
 0x819   :  { %v2882_v42 = vpop.f32.mrb[14].mxu0 }
 0x81a   :  { %v1615_v44 = vpop.f32.mrb[15].mxu0  ;;  %v1796_v57 = vsub.f32 %v3634_v2, %v2882_v42 }
 0x81b   :  { %v1795_v58 = vsub.f32 %v3632_v3, %v1615_v44 }
 0x81d   :  { %v2885_v46 = vpop.f32.mrb[16].mxu0 }
 0x81e   :  { %v1625_v49 = vpop.f32.mrb[17].mxu0  ;;  %v1798_v8 = vsub.f32 %v3636_v18, %v2885_v46 }
 0x81f   :  { %v1797_v14 = vsub.f32 %v3640_v20, %v1625_v49 }
 0x821   :  { %v1703_v50 = vpop.f32.mrb[18].mxu0 }
 0x822   :  { %v2890_v51 = vpop.f32.mrb[19].mxu0  ;;  %2891 = vmatprep.subr.msk.mxu0 %vm483_vm6, %v1703_v50 }
 0x823   :  { %2892 = vmatpush3.msk.msra.mxu0 %vm483_vm6, %v1703_v50 }
 0x824   :  { %2894 = vmatmul.mubr.msk.f32.vlgmr.msra.gmra.mrb[20].mxu0 %vm470_vm5, %v3459_v45  ;;  %2899 = vmatprep.subr.bf16.mxu0 %v3117_v1  ;;  %v3119_v45 = vld [vmem:[%s3871_s13 + $0x50] sm:$0xff]  }
 0x825   :  { %2896 = vmatprep.mubr.msk.f32.mxu0 %vm470_vm5, %v3465_v47  ;;  %2900 = vmatpush3.bf16.msra.mxu0 %v3117_v1  ;;  %v3120_v47 = vld [vmem:[%s3871_s13 + $0x58] sm:$0xff]  }
 0x826   :  { %2901 = vmatprep.subr.bf16.mxu0 %v3118_v43 }
 0x828   :  { %2897 = vmatmul.mubr.msk.f32.gmra.mrb[22].mxu0 %vm470_vm5, %v3475_v48  ;;  %v3121_v48 = vld [vmem:[%s3871_s13 + $0x60] sm:$0xff]   ;;  %vm2493_vm5 = vmneg %vm3530_vm12 }
 0x829   :  { %2902 = vmatpush3.bf16.msra.mxu0 %v3118_v43  ;;  %vm2494_vm6 = vmpackc.low %vm2493_vm5, %vm3235_vm14 }
 0x82a   :  { %2903 = vmatprep.subr.bf16.mxu0 %v3119_v45 }
 0x82d   :  { %2904 = vmatpush3.bf16.msra.mxu0 %v3119_v45 }
 0x82e   :  { %2905 = vmatprep.subr.bf16.mxu0 %v3120_v47 }
 0x831   :  { %2906 = vmatpush3.bf16.msra.mxu0 %v3120_v47 }
 0x832   :  { %2907 = vmatprep.subr.bf16.mxu0 %v3121_v48 }
 0x835   :  { %2908 = vmatpush3.bf16.msra.mxu0 %v3121_v48 }
 0x836   :  { %2909 = vmatprep.subr.bf16.mxu0 %v3122_v52 }
 0x839   :  { %2910 = vmatpush3.bf16.msra.mxu0 %v3122_v52 }
 0x83a   :  { %2911 = vmatprep.subr.bf16.mxu0 %v3123_v53 }
 0x83d   :  { %2912 = vmatpush3.bf16.msra.mxu0 %v3123_v53  ;;  %v3126_v53 = vld [vmem:[%s3871_s13 + $0x8] sm:$0xff]  }
 0x83e   :  { %2913 = vmatprep.subr.bf16.mxu0 %v3124_v54 }
 0x841   :  { %2914 = vmatpush3.bf16.msra.mxu0 %v3124_v54 }
 0x842   :  { %2919 = vmatprep.subr.bf16.mxu0 %v3734_v56 }
 0x8f7   :  { %v2895_v59 = vpop.f32.mrb[20].mxu0 }
 0x8f8   :  { %v1800_v61 = vmul.f32 %v2895_v59, %v1796_v57  ;;  %v1776_v62 = vpop.f32.mrb[21].mxu0 }
 0x8f9   :  { %v1799_v7 = vmul.f32 %v1795_v58, %v1776_v62 }
 0x8fa   :  { %v1811_v13 = vmul.f32 %v2419_v60, %v1800_v61 }
 0x8fb   :  { %v1810_v15 = vmul.f32 %v2419_v60, %v1799_v7  ;;  %v2898_v2 = vpop.f32.mrb[22].mxu0  ;;  %v3127_v7 = vld [vmem:[%s3871_s13 + $0x10] sm:$0xff]  }
 0x8fc   :  { %v1822_v3 = vadd.f32 %v2420_v63, %v1811_v13  ;;  %v1802_v19 = vmul.f32 %v2898_v2, %v1798_v8  ;;  %v1786_v21 = vpop.f32.mrb[23].mxu0  ;;  %v3128_v13 = vld [vmem:[%s3871_s13 + $0x18] sm:$0xff]   ;;  %v3133_v2 = vld [vmem:[%s3871_s13 + $0x80] sm:$0xff]  }
 0x8fd   :  { %v1821_v22 = vadd.f32 %v2420_v63, %v1810_v15  ;;  %v1801_v23 = vmul.f32 %v1797_v14, %v1786_v21  ;;  %v3131_v14 = vld [vmem:[%s3871_s13 + $0x30] sm:$0xff]   ;;  %v3132_v15 = vld [vmem:[%s3871_s13 + $0x38] sm:$0xff]   ;;  %v3138_v21 = vld [vmem:[%s3871_s13 + $0xa8] sm:$0xff]  }
 0x8fe   :  { %v2422_v6 = vmul.f32 -1.442695, %v1822_v3  ;;  %v1813_v24 = vmul.f32 %v2419_v60, %v1802_v19  ;;  %v3137_v19 = vld [vmem:[%s3871_s13 + $0xa0] sm:$0xff]  }
 0x8ff   :  { %v2421_v25 = vmul.f32 -1.442695, %v1821_v22  ;;  %v1812_v26 = vmul.f32 %v2419_v60, %v1801_v23  ;;  %v3140_v23 = vld [vmem:[%s3871_s13 + $0xb8] sm:$0xff]  }
 0x900   :  { %3165 = vpow2.f32 %v2422_v6  ;;  %v1824_v27 = vadd.f32 %v2420_v63, %v1813_v24  ;;  %v3141_v6 = vld [vmem:[%s3873_s15] sm:$0xff]   ;;  %v3142_v24 = vld [vmem:[%s3873_s15 + $0x8] sm:$0xff]  }
 0x901   :  { %3167 = vpow2.f32 %v2421_v25  ;;  %v1823_v4 = vadd.f32 %v2420_v63, %v1812_v26  ;;  %v3144_v25 = vld [vmem:[%s3873_s15 + $0x18] sm:$0xff]   ;;  %v2498_v26 = vld [vmem:[%s3874_s16] ss:$0 sm:$0xff] }
 0x902   :  { %v2424_v28 = vmul.f32 -1.442695, %v1824_v27 }
 0x903   :  { %v2423_v18 = vmul.f32 -1.442695, %v1823_v4 }
 0x904   :  { %3169 = vpow2.f32 %v2424_v28 }
 0x905   :  { %3171 = vpow2.f32 %v2423_v18 }
 0x90a   :  { %v3166_v20 = vpop.eup %3165 }
 0x90b   :  { %v3168_v55 = vpop.eup %3167  ;;  %v1838_v10 = vadd.f32 1.0, %v3166_v20 }
 0x90c   :  { %v1837_v29 = vadd.f32 1.0, %v3168_v55 }
 0x90d   :  { %3173 = vrcp.f32 %v1838_v10 }
 0x90e   :  { %v3170_v30 = vpop.eup %3169  ;;  %3175 = vrcp.f32 %v1837_v29 }
 0x90f   :  { %v3172_v31 = vpop.eup %3171  ;;  %v1840_v32 = vadd.f32 1.0, %v3170_v30 }
 0x910   :  { %v1839_v33 = vadd.f32 1.0, %v3172_v31 }
 0x911   :  { %3177 = vrcp.f32 %v1840_v32 }
 0x912   :  { %3179 = vrcp.f32 %v1839_v33 }
 0x917   :  { %v3174_v34 = vpop.eup %3173 }
 0x918   :  { %v3176_v0 = vpop.eup %3175  ;;  %v1850_v35 = vmul.f32 %v3174_v34, %v1822_v3  ;;  %v3134_v3 = vld [vmem:[%s3871_s13 + $0x88] sm:$0xff]  }
 0x919   :  { %v1849_v37 = vmul.f32 %v3176_v0, %v1821_v22  ;;  %v3139_v22 = vld [vmem:[%s3871_s13 + $0xb0] sm:$0xff]  }
 0x91a   :  { %v1854_v38 = vrot.slane %v1850_v35, 7  ;;  %v1866_v39 = vrot.slane %v1850_v35, 1 }
 0x91b   :  { %v3178_v40 = vpop.eup %3177  ;;  %v1853_v41 = vrot.slane %v1849_v37, 7  ;;  %v1865_v42 = vrot.slane %v1849_v37, 1  ;;  %v1895_v44 = vpack.c.bf16 %v1850_v35, %v1849_v37 }
 0x91c   :  { %v3180_v46 = vpop.eup %3179  ;;  %v1852_v49 = vmul.f32 %v3178_v40, %v1824_v27 }
 0x91d   :  { %v1851_v50 = vmul.f32 %v3180_v46, %v1823_v4  ;;  %2915 = vmatprep.mubr.bf16.mxu0 %v1895_v44  ;;  %v1859_v51 = vsel %vm852_vm7, %v1853_v41, %v1854_v38  ;;  %v1871_v1 = vsel %vm869_vm8, %v1865_v42, %v1866_v39 }
 0x91e   :  { %v1856_v43 = vrot.slane %v1852_v49, 7  ;;  %v1868_v45 = vrot.slane %v1852_v49, 1 }
 0x91f   :  { %v1855_v47 = vrot.slane %v1851_v50, 7  ;;  %v1867_v48 = vrot.slane %v1851_v50, 1  ;;  %v1896_v52 = vpack.c.bf16 %v1852_v49, %v1851_v50 }
 0x920   :  { %v1860_v54 = vsel %vm852_vm7, %v1856_v43, %v1853_v41  ;;  %v3761_v11 = vsel %vm869_vm8, %v1868_v45, %v1865_v42 }
 0x921   :  { %2916 = vmatmul.mubr.bf16.vlgmr.msra.gmra.mrb[24].mxu0 %v1896_v52  ;;  %v2459_v57 = vpack.c.bf16 %v1859_v51, %v1860_v54  ;;  %v1857_v58 = vsel %vm852_vm7, %v1855_v47, %v1856_v43  ;;  %v1858_v59 = vsel %vm852_vm7, %v1854_v38, %v1855_v47  ;;  %v1870_v60 = vsel %vm869_vm8, %v1866_v39, %v1867_v48 }
 0x922   :  { %2920 = vmatpush3.bf16.msra.mxu0 %v3734_v56  ;;  %v2463_v61 = vpack.c.bf16 %v1857_v58, %v1858_v59  ;;  %v2491_v62 = vpack.c.bf16 %v1870_v60, %v1871_v1  ;;  %v1869_v63 = vsel %vm869_vm8, %v1867_v48, %v1868_v45  ;;  %v3130_v56 = vld [vmem:[%s3871_s13 + $0x28] sm:$0xff]  }
 0x923   :  { %2935 = vmatprep.mubr.msk.bf16.mxu0 %vm2458_vm15, %v2459_v57  ;;  %2921 = vmatprep.subr.bf16.mxu0 %v3126_v53  ;;  %v2495_v8 = vpack.c.bf16 %v3761_v11, %v1869_v63 }
 0x926   :  { %2922 = vmatpush3.bf16.msra.mxu0 %v3126_v53 }
 0x927   :  { %2923 = vmatprep.subr.bf16.mxu0 %v3127_v7 }
 0x92a   :  { %2924 = vmatpush3.bf16.msra.mxu0 %v3127_v7 }
 0x92b   :  { %2925 = vmatprep.subr.bf16.mxu0 %v3128_v13 }
 0x92e   :  { %2926 = vmatpush3.bf16.msra.mxu0 %v3128_v13 }
 0x92f   :  { %2927 = vmatprep.subr.bf16.mxu0 %v3129_v36 }
 0x932   :  { %2928 = vmatpush3.bf16.msra.mxu0 %v3129_v36 }
 0x933   :  { %2929 = vmatprep.subr.bf16.mxu0 %v3130_v56 }
 0x936   :  { %2930 = vmatpush3.bf16.msra.mxu0 %v3130_v56 }
 0x937   :  { %2931 = vmatprep.subr.bf16.mxu0 %v3131_v14 }
 0x93a   :  { %2932 = vmatpush3.bf16.msra.mxu0 %v3131_v14 }
 0x93b   :  { %2933 = vmatprep.subr.bf16.mxu0 %v3132_v15 }
 0x93e   :  { %2934 = vmatpush3.bf16.msra.mxu0 %v3132_v15 }
 0x93f   :  { %2939 = vmatprep.subr.bf16.mxu0 %v3133_v2 }
 0x941   :  { %2936 = vmatmul.mubr.msk.bf16.vlgmr.msra.gmra.mrb[24].mxu0 %vm2462_vm3, %v2463_v61 }
 0x942   :  { %2940 = vmatpush3.bf16.msra.mxu0 %v3133_v2  ;;  %2955 = vmatprep.mubr.msk.bf16.mxu0 %vm2490_vm4, %v2491_v62 }
 0x943   :  { %2941 = vmatprep.subr.bf16.mxu0 %v3134_v3 }
 0x946   :  { %2942 = vmatpush3.bf16.msra.mxu0 %v3134_v3 }
 0x947   :  { %2943 = vmatprep.subr.bf16.mxu0 %v3135_v12 }
 0x94a   :  { %2944 = vmatpush3.bf16.msra.mxu0 %v3135_v12 }
 0x94b   :  { %2945 = vmatprep.subr.bf16.mxu0 %v3136_v16 }
 0x94e   :  { %2946 = vmatpush3.bf16.msra.mxu0 %v3136_v16 }
 0x94f   :  { %2947 = vmatprep.subr.bf16.mxu0 %v3137_v19 }
 0x952   :  { %2948 = vmatpush3.bf16.msra.mxu0 %v3137_v19 }
 0x953   :  { %2949 = vmatprep.subr.bf16.mxu0 %v3138_v21 }
 0x956   :  { %2950 = vmatpush3.bf16.msra.mxu0 %v3138_v21 }
 0x957   :  { %2951 = vmatprep.subr.bf16.mxu0 %v3139_v22 }
 0x95a   :  { %2952 = vmatpush3.bf16.msra.mxu0 %v3139_v22 }
 0x95b   :  { %2953 = vmatprep.subr.bf16.mxu0 %v3140_v23 }
 0x95e   :  { %2954 = vmatpush3.bf16.msra.mxu0 %v3140_v23 }
 0x95f   :  { %2959 = vmatprep.subr.bf16.mxu0 %v3141_v6 }
 0x961   :  { %2956 = vmatmul.mubr.msk.bf16.vlgmr.msra.gmra.mrb[24].mxu0 %vm2494_vm6, %v2495_v8 }
 0x962   :  { %2960 = vmatpush3.bf16.msra.mxu0 %v3141_v6  ;;  %2967 = vmatprep.mubr.msk.bf16.mxu0 %vm237_vm2, %v3364_v5  ;;  %v2497_v5 = vld [vmem:[%s3872_s14] ss:$0 sm:$0xff]  ;;  %s3203_s14 = scalar_lea.vmem %s2349_s0, 512 }
 0x963   :  { %2961 = vmatprep.subr.bf16.mxu0 %v3142_v24  ;;  %v3073_v27 = vadd.f32 %v2498_v26, %v2497_v5  ;;  %p3204_p8 = scmp.ne.s32.totalorder %s2349_s0, %s3203_s14  ;;  %p3209_p10 = scmp.lt.s32.totalorder %s3203_s14, %s3203_s14 }
 0x965   :  { %p3210_p11 = por %p3209_p10, %p3208_p9 }
 0x966   :  { %2962 = vmatpush3.bf16.msra.mxu0 %v3142_v24 }
 0x967   :  { %2963 = vmatprep.subr.bf16.mxu0 %v3143_v17  ;;  %p3211_p12 = pnand %p3210_p11, %p3204_p8 }
 0x96a   :  { %2964 = vmatpush3.bf16.msra.mxu0 %v3143_v17 }
 0x96b   :  { %2965 = vmatprep.subr.bf16.mxu0 %v3144_v25 }
 0x96e   :  { %2966 = vmatpush3.bf16.msra.mxu0 %v3144_v25 }
 0x971   :  { %2968 = vmatmul.mubr.msk.bf16.vlgmr.msra.gmra.mrb[24].mxu0 %vm237_vm2, %v3378_v9 }
 0xa44   :  { %v2969_v4 = vpop.f32.mrb[24].mxu0 }
 0xa45   :  { %v3067_v28 = vadd.f32 %v2969_v4, %v2497_v5  ;;  %v2320_v18 = vpop.f32.mrb[25].mxu0 }
 0xa46   :  { %v3069_v20 = vadd.f32 %v2497_v5, %v2320_v18  ;;  %v2970_v55 = vpop.f32.mrb[26].mxu0 }
 0xa47   :  { %v3068_v10 = vadd.f32 %v3067_v28, %v2498_v26  ;;  %v3072_v29 = vadd.f32 %v3073_v27, %v2970_v55  ;;  %v2323_v30 = vpop.f32.mrb[27].mxu0 }
 0xa48   :  { %v3070_v9 = vadd.f32 %v3069_v20, %v2498_v26  ;;  %v3074_v31 = vadd.f32 %v3073_v27, %v2323_v30 }
 0xa49   :  { %2341 = vst [vmem:[#allocation5 + $0x10] sm:$0xff] %v3068_v10  ;;  %2342 = vst [vmem:[#allocation5 + $0x18] sm:$0xff] %v3072_v29 }
 0xa4a   :  { %2339 = vst [vmem:[#allocation5] sm:$0xff] %v3070_v9  ;;  %2340 = vst [vmem:[#allocation5 + $0x8] sm:$0xff] %v3074_v31 }
 0xa4b   :  { %3214 = shalt.err (!%p3211_p12)
}
 0xa4c   :  { %s3215_s30 = scalar_lea.hbm %s3875_s17, 512 }
 0xa4d   :  { %p3216_p13 = scmp.ne.s32.totalorder %s3875_s17, %s3215_s30  ;;  %p3219_p0 = scmp.lt.u32.totalorder %s3215_s30, %s3875_s17 }
 0xa4f   :  { %p3221_p1 = pnand %p3219_p0, %p3216_p13 }
 0xa51   :  { %3224 = shalt.err (!%p3221_p1)
}
 0xa52   :  { %s3237_s4 = smov 128   ;;  %s3238_s20 = smov 8  }
 0xa53   :  { %2354 = dma.vmem_to_hbm [thread:$0]  %s2349_s0, 512, %s3875_s17, [#allocation4], %s3237_s4, %s3237_s4, %s3238_s20  }
 0xa54   :  { %3227 = dma.done.wait [#allocation4], 512  }
 0xa55   :  { %3228 = vsyncadd [#allocation4], 4294966784 }
 0xa56   :  { %2358 = vsyncpa [#allocation3], 1 }
 0xa57   :  { %2359 = vsyncpa [#allocation4], 1 }

</bundles_post_ra>
